<compile_context>
chip_gen: v7x
topology: tpu7x:2x2x1
jax: 0.10.0
libtpu: 0.0.40
codegen_flags: <defaults>
</compile_context>

<pallas_src>
import functools

import jax
import jax.numpy as jnp
from jax.experimental import pallas as pl
from jax.experimental.pallas import tpu as pltpu


def _lane_pad(c: int) -> int:
    """Pad a channel count to a multiple of 128 lanes when it is sizeable."""
    return ((c + 127) // 128) * 128 if c >= 64 else c


# ---------------------------------------------------------------------------
# Pallas kernel: one (batch n, row-tile t) step of a stride-1 "same" KxK conv
# ---------------------------------------------------------------------------
def _conv2d_same_kernel(x_ref, w_ref, b_ref, o_ref, *, k, th):
    """
    x_ref : (1, Hp, Wp, Cin)   bf16  padded image, resident across row tiles
    w_ref : (k*k, Cin, Cout)   bf16  resident across the whole grid
    b_ref : (1, Cout)          f32
    o_ref : (1, th, W, Cout)   f32
    """
    t = pl.program_id(1)
    w_out = o_ref.shape[2]
    cout = o_ref.shape[3]
    cin = x_ref.shape[3]
    m = th * w_out
    row0 = t * th

    acc = jnp.zeros((m, cout), jnp.float32)
    # k*k taps, unrolled at trace time; each tap is one bf16 MXU matmul with
    # f32 accumulation (no HIGHEST-precision multi-pass emulation).
    for kh in range(k):
        rows = x_ref[0, pl.ds(row0 + kh, th), :, :]        # (th, Wp, Cin)
        for kw in range(k):
            patch = rows[:, kw:kw + w_out, :]              # (th, W, Cin)
            acc = acc + jnp.dot(patch.reshape(m, cin),
                                w_ref[kh * k + kw],
                                preferred_element_type=jnp.float32)
    y = acc + b_ref[...]                                   # fused bias add
    # TODO(synk): widths that are not a multiple of 8 may need an explicit
    # relayout for this reshape; fine for the shapes used here.
    o_ref[...] = y.reshape(1, th, w_out, cout).astype(o_ref.dtype)


# ---------------------------------------------------------------------------
# Wrapper: NCHW in / NCHW out, matching Conv2d.forward (_conv2d_same_padding)
# ---------------------------------------------------------------------------
@functools.partial(jax.jit, static_argnames=("row_tile",))
def conv2d_same(x_nchw, weight_oihw, bias=None, *, row_tile=None):
    N, Cin, H, W = x_nchw.shape
    Cout, Cin_w, KH, KW = weight_oihw.shape
    if Cin_w != Cin or KH != KW:
        raise NotImplementedError(
            "TODO(synk): groups != 1 / non-square kernels not implemented")
    k = KH
    # 'same' padding exactly as _conv2d_same_padding (stride=1, dilation=1):
    # total pad = k-1 per spatial dim, odd extra row/col goes bottom/right.
    pad_lo = (k - 1) // 2
    pad_hi = (k - 1) - pad_lo

    cin_p = _lane_pad(Cin)
    cout_p = _lane_pad(Cout)

    # NCHW -> NHWC, bf16 activations.
    x = jnp.transpose(x_nchw, (0, 2, 3, 1)).astype(jnp.bfloat16)
    x = jnp.pad(x, ((0, 0), (pad_lo, pad_hi), (pad_lo, pad_hi),
                    (0, cin_p - Cin)))

    # OIHW -> (k*k, Cin, Cout), bf16, channel-padded.
    w = jnp.transpose(weight_oihw, (2, 3, 1, 0)).reshape(k * k, Cin, Cout)
    w = jnp.pad(w, ((0, 0), (0, cin_p - Cin), (0, cout_p - Cout)))
    w = w.astype(jnp.bfloat16)

    if bias is None:
        b = jnp.zeros((1, cout_p), jnp.float32)
    else:
        b = jnp.pad(bias.astype(jnp.float32).reshape(1, Cout),
                    ((0, 0), (0, cout_p - Cout)))

    # Row-tile the output so each grid step is a (row_tile*W, Cin)x(Cin, Cout)
    # matmul per tap and the output writeback pipelines across the grid.
    if row_tile is None:
        row_tile = H
        for cand in (64, 32, 16, 8):
            if H % cand == 0 and cand < H:
                row_tile = cand
                break
    n_tiles = H // row_tile
    Hp, Wp = H + k - 1, W + k - 1

    out = pl.pallas_call(
        functools.partial(_conv2d_same_kernel, k=k, th=row_tile),
        out_shape=jax.ShapeDtypeStruct((N, H, W, cout_p), jnp.float32),
        grid=(N, n_tiles),
        in_specs=[
            # padded image: same block for every row tile -> DMA'd once per n
            pl.BlockSpec((1, Hp, Wp, cin_p), lambda n, t: (n, 0, 0, 0)),
            # weights / bias: resident across the whole grid
            pl.BlockSpec((k * k, cin_p, cout_p), lambda n, t: (0, 0, 0)),
            pl.BlockSpec((1, cout_p), lambda n, t: (0, 0)),
        ],
        out_specs=pl.BlockSpec((1, row_tile, W, cout_p),
                               lambda n, t: (n, t, 0, 0)),
        compiler_params=pltpu.CompilerParams(
            dimension_semantics=("parallel", "parallel")),
    )(x, w, b)

    out = out[..., :Cout]                       # drop lane padding, if any
    return jnp.transpose(out, (0, 3, 1, 2))     # NHWC -> NCHW


# ---------------------------------------------------------------------------
# Reference with matched numerics (bf16 operands, f32 accumulation)
# ---------------------------------------------------------------------------
def conv2d_same_ref(x_nchw, weight_oihw, bias):
    k = weight_oihw.shape[2]
    pad_lo = (k - 1) // 2
    pad_hi = (k - 1) - pad_lo
    x = jnp.transpose(x_nchw, (0, 2, 3, 1)).astype(jnp.bfloat16)
    w = jnp.transpose(weight_oihw, (2, 3, 1, 0)).astype(jnp.bfloat16)
    y = jax.lax.conv_general_dilated(
        x, w, window_strides=(1, 1),
        padding=[(pad_lo, pad_hi), (pad_lo, pad_hi)],
        dimension_numbers=("NHWC", "HWIO", "NHWC"),
        preferred_element_type=jnp.float32)
    y = y + bias.astype(jnp.float32)
    return jnp.transpose(y, (0, 3, 1, 2))


# ---------------------------------------------------------------------------
if __name__ == "__main__":
    key = jax.random.PRNGKey(0)
    kx, kw, kb = jax.random.split(key, 3)

    N, Cin, H, W = 2, 4, 16, 16
    Cout, ksz = 4, 3                     # Conv2d(4, 4, kernel_size=3), bias=True

    x = jax.random.normal(kx, (N, Cin, H, W), jnp.float32)
    stdv = 1.0 / (Cin * ksz * ksz) ** 0.5      # matches _ConvNd.reset_parameters
    w = jax.random.uniform(kw, (Cout, Cin, ksz, ksz), jnp.float32, -stdv, stdv)
    b = jax.random.uniform(kb, (Cout,), jnp.float32, -stdv, stdv)

    out = jax.block_until_ready(conv2d_same(x, w, b))
    ref = conv2d_same_ref(x, w, b)

    assert out.shape == (N, Cout, H, W) and out.dtype == jnp.float32
    max_err = float(jnp.max(jnp.abs(out - ref)))
    assert jnp.allclose(out, ref, atol=1e-3, rtol=1e-3), max_err

    print("KERNEL_OK")
</pallas_src>

<mosaic_0001>
module attributes {stable_mosaic.version = 11 : i64} {
  func.func @_conv2d_same_kernel(%arg0: i32, %arg1: i32, %arg2: memref<1x18x18x4xbf16, #tpu.memory_space<vmem>>, %arg3: memref<9x4x4xbf16, #tpu.memory_space<vmem>>, %arg4: memref<1x4xf32, #tpu.memory_space<vmem>>, %arg5: memref<1x8x16x4xf32, #tpu.memory_space<vmem>>) attributes {dimension_semantics = [#tpu.dimension_semantics<parallel>, #tpu.dimension_semantics<parallel>], iteration_bounds = array<i64: 2, 2>, scalar_prefetch = 0 : i64, scratch_operands = 0 : i64, tpu.core_type = #tpu.core_type<tc>, window_params = [{transform_indices = @transform_0, window_bounds = array<i64: 1, 18, 18, 4>}, {pipeline_mode = #tpu.pipeline_mode<synchronous>, transform_indices = @transform_1, window_bounds = array<i64: 9, 4, 4>}, {pipeline_mode = #tpu.pipeline_mode<synchronous>, transform_indices = @transform_2, window_bounds = array<i64: 1, 4>}, {transform_indices = @transform_3, window_bounds = array<i64: 1, 8, 16, 4>}]} {
    %c8_i32 = arith.constant 8 : i32
    %0 = arith.muli %arg1, %c8_i32 : i32
    %cst = arith.constant 0.000000e+00 : f32
    %1 = vector.broadcast %cst : f32 to vector<128x4xf32>
    %c0_i32 = arith.constant 0 : i32
    %2 = arith.addi %0, %c0_i32 : i32
    %c0 = arith.constant 0 : index
    %3 = arith.index_cast %2 : i32 to index
    %c0_0 = arith.constant 0 : index
    %c0_1 = arith.constant 0 : index
    %4 = vector.load %arg2[%c0, %3, %c0_0, %c0_1] : memref<1x18x18x4xbf16, #tpu.memory_space<vmem>>, vector<1x8x18x4xbf16>
    %5 = vector.shape_cast %4 : vector<1x8x18x4xbf16> to vector<8x18x4xbf16>
    %6 = vector.extract_strided_slice %5 {offsets = [0, 0, 0], sizes = [8, 16, 4], strides = [1, 1, 1]} : vector<8x18x4xbf16> to vector<8x16x4xbf16>
    %7 = vector.shape_cast %6 : vector<8x16x4xbf16> to vector<128x4xbf16>
    %c0_2 = arith.constant 0 : index
    %c0_3 = arith.constant 0 : index
    %c0_4 = arith.constant 0 : index
    %8 = vector.load %arg3[%c0_2, %c0_3, %c0_4] : memref<9x4x4xbf16, #tpu.memory_space<vmem>>, vector<1x4x4xbf16>
    %9 = vector.shape_cast %8 : vector<1x4x4xbf16> to vector<4x4xbf16>
    %cst_5 = arith.constant dense<0.000000e+00> : vector<128x4xf32>
    %10 = tpu.matmul %7, %9, %cst_5 {dimension_numbers = #tpu.dot_dimension_numbers<[1], [0], [0], [1], [0, 0, 1, 1], [], []>} : vector<128x4xbf16>, vector<4x4xbf16>, vector<128x4xf32> -> vector<128x4xf32>
    %11 = arith.addf %1, %10 : vector<128x4xf32>
    %12 = vector.extract_strided_slice %5 {offsets = [0, 1, 0], sizes = [8, 16, 4], strides = [1, 1, 1]} : vector<8x18x4xbf16> to vector<8x16x4xbf16>
    %13 = vector.shape_cast %12 : vector<8x16x4xbf16> to vector<128x4xbf16>
    %c1 = arith.constant 1 : index
    %c0_6 = arith.constant 0 : index
    %c0_7 = arith.constant 0 : index
    %14 = vector.load %arg3[%c1, %c0_6, %c0_7] : memref<9x4x4xbf16, #tpu.memory_space<vmem>>, vector<1x4x4xbf16>
    %15 = vector.shape_cast %14 : vector<1x4x4xbf16> to vector<4x4xbf16>
    %cst_8 = arith.constant dense<0.000000e+00> : vector<128x4xf32>
    %16 = tpu.matmul %13, %15, %cst_8 {dimension_numbers = #tpu.dot_dimension_numbers<[1], [0], [0], [1], [0, 0, 1, 1], [], []>} : vector<128x4xbf16>, vector<4x4xbf16>, vector<128x4xf32> -> vector<128x4xf32>
    %17 = arith.addf %11, %16 : vector<128x4xf32>
    %18 = vector.extract_strided_slice %5 {offsets = [0, 2, 0], sizes = [8, 16, 4], strides = [1, 1, 1]} : vector<8x18x4xbf16> to vector<8x16x4xbf16>
    %19 = vector.shape_cast %18 : vector<8x16x4xbf16> to vector<128x4xbf16>
    %c2 = arith.constant 2 : index
    %c0_9 = arith.constant 0 : index
    %c0_10 = arith.constant 0 : index
    %20 = vector.load %arg3[%c2, %c0_9, %c0_10] : memref<9x4x4xbf16, #tpu.memory_space<vmem>>, vector<1x4x4xbf16>
    %21 = vector.shape_cast %20 : vector<1x4x4xbf16> to vector<4x4xbf16>
    %cst_11 = arith.constant dense<0.000000e+00> : vector<128x4xf32>
    %22 = tpu.matmul %19, %21, %cst_11 {dimension_numbers = #tpu.dot_dimension_numbers<[1], [0], [0], [1], [0, 0, 1, 1], [], []>} : vector<128x4xbf16>, vector<4x4xbf16>, vector<128x4xf32> -> vector<128x4xf32>
    %23 = arith.addf %17, %22 : vector<128x4xf32>
    %c1_i32 = arith.constant 1 : i32
    %24 = arith.addi %0, %c1_i32 : i32
    %c0_12 = arith.constant 0 : index
    %25 = arith.index_cast %24 : i32 to index
    %c0_13 = arith.constant 0 : index
    %c0_14 = arith.constant 0 : index
    %26 = vector.load %arg2[%c0_12, %25, %c0_13, %c0_14] : memref<1x18x18x4xbf16, #tpu.memory_space<vmem>>, vector<1x8x18x4xbf16>
    %27 = vector.shape_cast %26 : vector<1x8x18x4xbf16> to vector<8x18x4xbf16>
    %28 = vector.extract_strided_slice %27 {offsets = [0, 0, 0], sizes = [8, 16, 4], strides = [1, 1, 1]} : vector<8x18x4xbf16> to vector<8x16x4xbf16>
    %29 = vector.shape_cast %28 : vector<8x16x4xbf16> to vector<128x4xbf16>
    %c3 = arith.constant 3 : index
    %c0_15 = arith.constant 0 : index
    %c0_16 = arith.constant 0 : index
    %30 = vector.load %arg3[%c3, %c0_15, %c0_16] : memref<9x4x4xbf16, #tpu.memory_space<vmem>>, vector<1x4x4xbf16>
    %31 = vector.shape_cast %30 : vector<1x4x4xbf16> to vector<4x4xbf16>
    %cst_17 = arith.constant dense<0.000000e+00> : vector<128x4xf32>
    %32 = tpu.matmul %29, %31, %cst_17 {dimension_numbers = #tpu.dot_dimension_numbers<[1], [0], [0], [1], [0, 0, 1, 1], [], []>} : vector<128x4xbf16>, vector<4x4xbf16>, vector<128x4xf32> -> vector<128x4xf32>
    %33 = arith.addf %23, %32 : vector<128x4xf32>
    %34 = vector.extract_strided_slice %27 {offsets = [0, 1, 0], sizes = [8, 16, 4], strides = [1, 1, 1]} : vector<8x18x4xbf16> to vector<8x16x4xbf16>
    %35 = vector.shape_cast %34 : vector<8x16x4xbf16> to vector<128x4xbf16>
    %c4 = arith.constant 4 : index
    %c0_18 = arith.constant 0 : index
    %c0_19 = arith.constant 0 : index
    %36 = vector.load %arg3[%c4, %c0_18, %c0_19] : memref<9x4x4xbf16, #tpu.memory_space<vmem>>, vector<1x4x4xbf16>
    %37 = vector.shape_cast %36 : vector<1x4x4xbf16> to vector<4x4xbf16>
    %cst_20 = arith.constant dense<0.000000e+00> : vector<128x4xf32>
    %38 = tpu.matmul %35, %37, %cst_20 {dimension_numbers = #tpu.dot_dimension_numbers<[1], [0], [0], [1], [0, 0, 1, 1], [], []>} : vector<128x4xbf16>, vector<4x4xbf16>, vector<128x4xf32> -> vector<128x4xf32>
    %39 = arith.addf %33, %38 : vector<128x4xf32>
    %40 = vector.extract_strided_slice %27 {offsets = [0, 2, 0], sizes = [8, 16, 4], strides = [1, 1, 1]} : vector<8x18x4xbf16> to vector<8x16x4xbf16>
    %41 = vector.shape_cast %40 : vector<8x16x4xbf16> to vector<128x4xbf16>
    %c5 = arith.constant 5 : index
    %c0_21 = arith.constant 0 : index
    %c0_22 = arith.constant 0 : index
    %42 = vector.load %arg3[%c5, %c0_21, %c0_22] : memref<9x4x4xbf16, #tpu.memory_space<vmem>>, vector<1x4x4xbf16>
    %43 = vector.shape_cast %42 : vector<1x4x4xbf16> to vector<4x4xbf16>
    %cst_23 = arith.constant dense<0.000000e+00> : vector<128x4xf32>
    %44 = tpu.matmul %41, %43, %cst_23 {dimension_numbers = #tpu.dot_dimension_numbers<[1], [0], [0], [1], [0, 0, 1, 1], [], []>} : vector<128x4xbf16>, vector<4x4xbf16>, vector<128x4xf32> -> vector<128x4xf32>
    %45 = arith.addf %39, %44 : vector<128x4xf32>
    %c2_i32 = arith.constant 2 : i32
    %46 = arith.addi %0, %c2_i32 : i32
    %c0_24 = arith.constant 0 : index
    %47 = arith.index_cast %46 : i32 to index
    %c0_25 = arith.constant 0 : index
    %c0_26 = arith.constant 0 : index
    %48 = vector.load %arg2[%c0_24, %47, %c0_25, %c0_26] : memref<1x18x18x4xbf16, #tpu.memory_space<vmem>>, vector<1x8x18x4xbf16>
    %49 = vector.shape_cast %48 : vector<1x8x18x4xbf16> to vector<8x18x4xbf16>
    %50 = vector.extract_strided_slice %49 {offsets = [0, 0, 0], sizes = [8, 16, 4], strides = [1, 1, 1]} : vector<8x18x4xbf16> to vector<8x16x4xbf16>
    %51 = vector.shape_cast %50 : vector<8x16x4xbf16> to vector<128x4xbf16>
    %c6 = arith.constant 6 : index
    %c0_27 = arith.constant 0 : index
    %c0_28 = arith.constant 0 : index
    %52 = vector.load %arg3[%c6, %c0_27, %c0_28] : memref<9x4x4xbf16, #tpu.memory_space<vmem>>, vector<1x4x4xbf16>
    %53 = vector.shape_cast %52 : vector<1x4x4xbf16> to vector<4x4xbf16>
    %cst_29 = arith.constant dense<0.000000e+00> : vector<128x4xf32>
    %54 = tpu.matmul %51, %53, %cst_29 {dimension_numbers = #tpu.dot_dimension_numbers<[1], [0], [0], [1], [0, 0, 1, 1], [], []>} : vector<128x4xbf16>, vector<4x4xbf16>, vector<128x4xf32> -> vector<128x4xf32>
    %55 = arith.addf %45, %54 : vector<128x4xf32>
    %56 = vector.extract_strided_slice %49 {offsets = [0, 1, 0], sizes = [8, 16, 4], strides = [1, 1, 1]} : vector<8x18x4xbf16> to vector<8x16x4xbf16>
    %57 = vector.shape_cast %56 : vector<8x16x4xbf16> to vector<128x4xbf16>
    %c7 = arith.constant 7 : index
    %c0_30 = arith.constant 0 : index
    %c0_31 = arith.constant 0 : index
    %58 = vector.load %arg3[%c7, %c0_30, %c0_31] : memref<9x4x4xbf16, #tpu.memory_space<vmem>>, vector<1x4x4xbf16>
    %59 = vector.shape_cast %58 : vector<1x4x4xbf16> to vector<4x4xbf16>
    %cst_32 = arith.constant dense<0.000000e+00> : vector<128x4xf32>
    %60 = tpu.matmul %57, %59, %cst_32 {dimension_numbers = #tpu.dot_dimension_numbers<[1], [0], [0], [1], [0, 0, 1, 1], [], []>} : vector<128x4xbf16>, vector<4x4xbf16>, vector<128x4xf32> -> vector<128x4xf32>
    %61 = arith.addf %55, %60 : vector<128x4xf32>
    %62 = vector.extract_strided_slice %49 {offsets = [0, 2, 0], sizes = [8, 16, 4], strides = [1, 1, 1]} : vector<8x18x4xbf16> to vector<8x16x4xbf16>
    %63 = vector.shape_cast %62 : vector<8x16x4xbf16> to vector<128x4xbf16>
    %c8 = arith.constant 8 : index
    %c0_33 = arith.constant 0 : index
    %c0_34 = arith.constant 0 : index
    %64 = vector.load %arg3[%c8, %c0_33, %c0_34] : memref<9x4x4xbf16, #tpu.memory_space<vmem>>, vector<1x4x4xbf16>
    %65 = vector.shape_cast %64 : vector<1x4x4xbf16> to vector<4x4xbf16>
    %cst_35 = arith.constant dense<0.000000e+00> : vector<128x4xf32>
    %66 = tpu.matmul %63, %65, %cst_35 {dimension_numbers = #tpu.dot_dimension_numbers<[1], [0], [0], [1], [0, 0, 1, 1], [], []>} : vector<128x4xbf16>, vector<4x4xbf16>, vector<128x4xf32> -> vector<128x4xf32>
    %67 = arith.addf %61, %66 : vector<128x4xf32>
    %c0_36 = arith.constant 0 : index
    %c0_37 = arith.constant 0 : index
    %68 = vector.load %arg4[%c0_36, %c0_37] : memref<1x4xf32, #tpu.memory_space<vmem>>, vector<1x4xf32>
    %69 = vector.broadcast %68 : vector<1x4xf32> to vector<128x4xf32>
    %70 = arith.addf %67, %69 : vector<128x4xf32>
    %71 = vector.shape_cast %70 : vector<128x4xf32> to vector<1x8x16x4xf32>
    %c0_38 = arith.constant 0 : index
    %c0_39 = arith.constant 0 : index
    %c0_40 = arith.constant 0 : index
    %c0_41 = arith.constant 0 : index
    %72 = vector.load %arg5[%c0_38, %c0_39, %c0_40, %c0_41] : memref<1x8x16x4xf32, #tpu.memory_space<vmem>>, vector<1x8x16x4xf32>
    tpu.vector_store %arg5[%c0_38, %c0_39, %c0_40, %c0_41], %71 {strides = array<i32>} : memref<1x8x16x4xf32, #tpu.memory_space<vmem>>, vector<1x8x16x4xf32>,
    return
  }
  func.func @transform_0(%arg0: i32, %arg1: i32) -> (i32, i32, i32, i32) {
    %c0_i32 = arith.constant 0 : i32
    %c0_i32_0 = arith.constant 0 : i32
    %c0_i32_1 = arith.constant 0 : i32
    %c0_i32_2 = arith.constant 0 : i32
    return %arg0, %c0_i32, %c0_i32_0, %c0_i32_1 : i32, i32, i32, i32
  }
  func.func @transform_1(%arg0: i32, %arg1: i32) -> (i32, i32, i32) {
    %c0_i32 = arith.constant 0 : i32
    %c0_i32_0 = arith.constant 0 : i32
    %c0_i32_1 = arith.constant 0 : i32
    %c0_i32_2 = arith.constant 0 : i32
    return %c0_i32, %c0_i32_0, %c0_i32_1 : i32, i32, i32
  }
  func.func @transform_2(%arg0: i32, %arg1: i32) -> (i32, i32) {
    %c0_i32 = arith.constant 0 : i32
    %c0_i32_0 = arith.constant 0 : i32
    %c0_i32_1 = arith.constant 0 : i32
    return %c0_i32, %c0_i32_0 : i32, i32
  }
  func.func @transform_3(%arg0: i32, %arg1: i32) -> (i32, i32, i32, i32) {
    %c0_i32 = arith.constant 0 : i32
    %c0_i32_0 = arith.constant 0 : i32
    %c0_i32_1 = arith.constant 0 : i32
    return %arg0, %arg1, %c0_i32, %c0_i32_0 : i32, i32, i32, i32
  }
}

</mosaic_0001>

<bundles_post_ra>
// kernel: conv2d_same.1
= control target key start
LH: loop header
LB: loop body
LE: loop exit
PB: predicated region body
PF: predicated region fallthrough
CT: control target
= control target key end

     0   :  { %s3466_s12 = smov 0   ;;  %s3468_s13 = smov 0   ;;  %s4516_s0 = inlined_call_operand.vmem [shape: bf16[2,18,18,4], index: 0, kind: input, shape index: {}]   ;;  %s4517_s1 = inlined_call_operand.vmem [shape: bf16[9,4,4], index: 1, kind: input, shape index: {}]   ;;  %s4518_s2 = inlined_call_operand.vmem [shape: f32[1,4], index: 2, kind: input, shape index: {}]   ;;  %s4519_s3 = inlined_call_operand.vmem [shape: f32[2,16,16,4], index: 3, kind: output, shape index: {}]  }
   0x1   :  { %s3470_s14 = smov 0   ;;  %s3472_s15 = smov 0  }
   0x2   :  { %s3474_s16 = smov 0  }
   0x3 LB: > { %s22_s17 = sadd.s32 1, %s3436_s14  ;;  %s25_s18 = sadd.s32 1, %s3440_s15  ;;  %s3444_s16 = sphi %s3474_s16, %s13_s16   ;;  %s3440_s15 = sphi %s3472_s15, %s4602_s15   ;;  %s3436_s14 = sphi %s3470_s14, %s4601_s14   ;;  %s3432_s13 = sphi %s3468_s13, %s4600_s13   ;;  %s3428_s12 = sphi %s3466_s12, %s4599_s12  }
   0x4   : > { %p23_p0 = scmp.ge.s32.totalorder %s22_s17, 2  ;;  %p2709_p1 = scmp.ge.s32.totalorder %s3444_s16, 1 }
   0x5   : > { %p151_p2 = scmp.lt.s32.totalorder %s3444_s16, 5 }
   0x6   : > { %s4604_s17 = smov (%p23_p0, %s22_s17), 0  ;;  %s4606_s18 = smov (!%p23_p0, %s25_s18), %s3440_s15 }
   0x7   : > { %p152_p3 = pnand %p2709_p1, %p151_p2  ;;  %p27_p4 = scmp.ge.s32.totalorder %s4606_s18, 2 }
   0x9   : > { %s4608_s18 = smov (%p27_p4, %s4606_s18), 0  ;;  %155 = sbr.rel (%p152_p3) target bundleno = 419 (0x1a3), region = 32 }
  0x10   : > { %v2718_v0 = vld [vmem:[%s4517_s1 + $0x2] sm:$0x3]  ;;  %vm472_vm0 = vcmask 1041408   ;;  %v2819_v1 = vld [vmem:[%s4517_s1 + $0x8] sm:$0x3]  ;;  %p180_p5 = scmp.lt.s32.totalorder %s3432_s13, 1 }
  0x11   : > { %3323 = vmatprep.subr.msk.bf16.mxu1 %vm472_vm0, %v2718_v0  ;;  %3327 = vmatprep.subr.msk.bf16.mxu0 %vm472_vm0, %v2819_v1  ;;  %v474_v2 = vsel %vm472_vm0, %v2718_v0, 0  ;;  %v3508_v3 = vsel %vm472_vm0, %v2819_v1, 0  ;;  %v225_v4 = vld [vmem:[%s4517_s1] sm:$0x3]  ;;  %s2949_s25 = smul.u32 96, %s3428_s12  ;;  %vm447_vm3 = vcmask 31744  }
  0x12   : > { %4544 = vst [vmem:[#allocation2_spill] sm:$0xff] %v3508_v3  ;;  %3032 = vmatpush3.bf16.msra.mxu1 %v474_v2  ;;  %3104 = vmatpush3.bf16.msra.mxu0 %v3508_v3  ;;  %s4610_s13 = smov (!%p180_p5, %s3432_s13), 1  ;;  %v2844_v5 = vld [vmem:[%s4517_s1 + $0xa] sm:$0x3]  ;;  %vm226_vm1 = vsmask.f32 3328 }
  0x13   : > { %3324 = vmatprep.subr.msk.bf16.mxu1 %vm472_vm0, %v225_v4  ;;  %s3333_s28 = smul.u32 216, %s4610_s13  ;;  %3329 = vmatprep.subr.msk.bf16.mxu0 %vm472_vm0, %v2844_v5  ;;  %vm227_vm2 = vsmask.f32 7440  ;;  %v3552_v17 = vsel %vm472_vm0, %v225_v4, 0  ;;  %v3572_v36 = vsel %vm472_vm0, %v2844_v5, 0  ;;  %vm745_vm5 = vcmask 1042432  }
  0x14   : > { %vm3567_vm4 = vmor %vm226_vm1, %vm227_vm2  ;;  %v3588_v50 = vld [vmem:[%s4517_s1 + $0xc] sm:$0x3]  ;;  %vm746_vm6 = vcmask 1046532   ;;  %s2713_s27 = sshll.u32 %s4610_s13, 5 }
  0x15   : > { %s184_s4 = scalar_lea.vmem %s4516_s0, %s3333_s28  ;;  %v3606_v1 = vsel %vm472_vm0, %v3588_v50, 0  ;;  %vm3733_vm7 = vmor %vm745_vm5, %vm746_vm6 }
  0x16   : > { %s3526_s5 = scalar_lea.vmem %s184_s4, %s2949_s25  ;;  %s2711_s25 = sshll.u32 %s3428_s12, 3 }
  0x17   : > { %v3529_v6 = vld [vmem:[%s3526_s5] sm:$0xf]  ;;  %v3532_v7 = vld [vmem:[%s3526_s5 + $0x4] sm:$0xf]  ;;  %v3535_v8 = vld [vmem:[%s3526_s5 + $0x8] sm:$0x1] }
  0x18   : > { %v230_v9 = vshrl.u32 %v3529_v6, 16  ;;  %v233_v10 = vshll.u32 %v3529_v6, 16  ;;  %v239_v11 = vshll.u32 %v3532_v7, 16  ;;  %v243_v12 = vshrl.u32 %v3532_v7, 16  ;;  %v3542_v13 = vld [vmem:[%s3526_s5 + $0xc] sm:$0xf] }
  0x19   : > { %v249_v14 = vshll.u32 %v3535_v8, 16  ;;  %v3546_v15 = vld [vmem:[%s3526_s5 + $0x10] sm:$0xf]  ;;  %v3549_v16 = vld [vmem:[%s3526_s5 + $0x14] sm:$0x1]  ;;  %v1181_v23 = vshrl.u32 %v3542_v13, 16 }
  0x1a   : > { %v232_v18 = vrot.slane %v230_v9, 4  ;;  %v235_v19 = vrot.slane %v233_v10, 5  ;;  %v241_v20 = vrot.slane %v239_v11, 5  ;;  %v245_v21 = vrot.slane %v243_v12, 4  ;;  %v3560_v30 = vld [vmem:[%s3526_s5 + $0xc] sm:$0xf] }
  0x1b   : > { %v251_v22 = vrot.slane %v249_v14, 5  ;;  %v1184_v24 = vshll.u32 %v3542_v13, 16  ;;  %v1190_v25 = vshll.u32 %v3546_v15, 16  ;;  %v1194_v28 = vshrl.u32 %v3546_v15, 16  ;;  %v3563_v31 = vld [vmem:[%s3526_s5 + $0x10] sm:$0xf] }
  0x1c   : > { %v236_v26 = vor.u32 %v235_v19, %v232_v18  ;;  %v246_v27 = vor.u32 %v245_v21, %v241_v20  ;;  %v1200_v29 = vshll.u32 %v3549_v16, 16  ;;  %v1183_v33 = vrot.slane %v1181_v23, 4  ;;  %v3575_v42 = vld [vmem:[%s3526_s5 + $0x14] sm:$0x1]  ;;  %v3591_v55 = vld [vmem:[%s3526_s5 + $0x18] sm:$0xf] }
  0x1d   : > { %v1186_v34 = vrot.slane %v1184_v24, 5  ;;  %v1192_v35 = vrot.slane %v1190_v25, 5  ;;  %v1196_v39 = vrot.slane %v1194_v28, 4  ;;  %v254_v43 = vshrl.u32 %v3560_v30, 16  ;;  %v3595_v60 = vld [vmem:[%s3526_s5 + $0x1c] sm:$0xf] }
  0x1e   : > { %v237_v37 = vrot.slane %v236_v26, 4  ;;  %v247_v38 = vrot.slane %v246_v27, 4  ;;  %v1202_v40 = vrot.slane %v1200_v29, 5  ;;  %v257_v44 = vshll.u32 %v3560_v30, 16  ;;  %v3602_v0 = vld [vmem:[%s3526_s5 + $0x20] sm:$0x1] }
  0x1f   : > { %v1187_v41 = vor.u32 %v1186_v34, %v1183_v33  ;;  %v263_v45 = vshll.u32 %v3563_v31, 16  ;;  %v1197_v48 = vor.u32 %v1196_v39, %v1192_v35  ;;  %v267_v49 = vshrl.u32 %v3563_v31, 16  ;;  %v3614_v18 = vld [vmem:[%s3526_s5 + $0x18] sm:$0xf]  ;;  %v3619_v23 = vld [vmem:[%s3526_s5 + $0x1c] sm:$0xf] }
  0x20   : > { %v242_v46 = vsel %vm3567_vm4, %v237_v37, %v241_v20  ;;  %v252_v47 = vsel %vm3567_vm4, %v247_v38, %v251_v22  ;;  %v256_v53 = vrot.slane %v254_v43, 4  ;;  %v259_v54 = vrot.slane %v257_v44, 5  ;;  %v3626_v28 = vld [vmem:[%s3526_s5 + $0x20] sm:$0x1]  ;;  %v3632_v37 = vld [vmem:[%s3526_s5 + $0x24] sm:$0xf] }
  0x21   : > { %v2719_v51 = vcombine.low %v242_v46, %v252_v47  ;;  %v1188_v52 = vrot.slane %v1187_v41, 4  ;;  %v1198_v56 = vrot.slane %v1197_v48, 4  ;;  %v265_v57 = vrot.slane %v263_v45, 5  ;;  %v3642_v47 = vld [vmem:[%s4517_s1 + $0x4] sm:$0x3]  ;;  %p188_p6 = scmp.lt.s32.totalorder %s2711_s25, 15 }
  0x22   : > { %v269_v58 = vrot.slane %v267_v49, 4  ;;  %v273_v59 = vshll.u32 %v3575_v42, 16  ;;  %v1551_v62 = vrot.slane %v3549_v16, 5  ;;  %v260_v63 = vor.u32 %v259_v54, %v256_v53  ;;  %v4145_v3 = vld [vmem:[%s3526_s5 + $0x6c] sm:$0xf] }
  0x23   : > { %3033 = vmatprep.mubr.msk.bf16.mxu1 %vm447_vm3, %v2719_v51  ;;  %v1193_v61 = vsel %vm3567_vm4, %v1188_v52, %v1192_v35  ;;  %v1203_v2 = vsel %vm3567_vm4, %v1198_v56, %v1202_v40  ;;  %v1205_v9 = vshrl.u32 %v3591_v55, 16  ;;  %v1208_v12 = vshll.u32 %v3591_v55, 16  ;;  %v3646_v52 = vld [vmem:[%s3526_s5 + $0x28] sm:$0xf]  ;;  %4569 = vst [vmem:[#allocation20_spill] sm:$0xff] %v4145_v3  ;;  %s4612_s25 = smov (!%p188_p6, %s2711_s25), 15 }
  0x24   : > { %v270_v4 = vor.u32 %v269_v58, %v265_v57  ;;  %v275_v5 = vrot.slane %v273_v59, 5  ;;  %v2820_v10 = vcombine.low %v1193_v61, %v1203_v2  ;;  %v261_v11 = vrot.slane %v260_v63, 4  ;;  %v3651_v59 = vld [vmem:[%s3526_s5 + $0x2c] sm:$0x1]  ;;  %s2712_s26 = sshll.u32 %s4612_s25, 1 }
  0x25   : > { %v1214_v14 = vshll.u32 %v3595_v60, 16  ;;  %v1207_v20 = vrot.slane %v1205_v9, 4  ;;  %v1218_v21 = vshrl.u32 %v3595_v60, 16  ;;  %v1224_v22 = vshll.u32 %v3602_v0, 16  ;;  %s192_s28 = sadd.s32 %s2713_s27, %s2712_s26 }
  0x26   : > { %v271_v19 = vrot.slane %v270_v4, 4  ;;  %3105 = vmatprep.mubr.msk.bf16.mxu0 %vm447_vm3, %v2820_v10  ;;  %v266_v24 = vsel %vm3567_vm4, %v261_v11, %v265_v57  ;;  %v1210_v25 = vrot.slane %v1208_v12, 5  ;;  %v1555_v27 = vrot.slane %v3595_v60, 5  ;;  %s2714_s29 = sshll.u32 %s192_s28, 3 }
  0x27   : > { %v1216_v26 = vrot.slane %v1214_v14, 5  ;;  %v1220_v33 = vrot.slane %v1218_v21, 4  ;;  %v1226_v34 = vrot.slane %v1224_v22, 5  ;;  %v1558_v35 = vrot.slane %v3602_v0, 5  ;;  %v3667_v21 = vld [vmem:[%s3526_s5 + $0x28] sm:$0xf]  ;;  %s4451_s6 = scalar_lea.vmem %s4519_s3, %s2714_s29 }
  0x28   : > { %v276_v29 = vsel %vm3567_vm4, %v271_v19, %v275_v5  ;;  %v1211_v39 = vor.u32 %v1210_v25, %v1207_v20  ;;  %v278_v40 = vshrl.u32 %v3614_v18, 16  ;;  %v281_v41 = vshll.u32 %v3614_v18, 16  ;;  %v3657_v5 = vld [vmem:[%s3526_s5 + $0x24] sm:$0xf] }
  0x29   : > { %v2720_v38 = vcombine.low %v266_v24, %v276_v29  ;;  %v1221_v43 = vor.u32 %v1220_v33, %v1216_v26  ;;  %v287_v44 = vshll.u32 %v3619_v23, 16  ;;  %v291_v45 = vshrl.u32 %v3619_v23, 16 }
  0x2a   : > { %v297_v46 = vshll.u32 %v3626_v28, 16  ;;  %v1212_v48 = vrot.slane %v1211_v39, 4  ;;  %v280_v49 = vrot.slane %v278_v40, 4  ;;  %v283_v51 = vrot.slane %v281_v41, 5  ;;  %v3678_v40 = vld [vmem:[%s3526_s5 + $0x30] sm:$0xf] }
  0x2b   : > { %3034 = vmatmul.mubr.msk.bf16.vlgmr.msra.gmra.mrb[0].mxu1 %vm447_vm3, %v2720_v38  ;;  %v1229_v53 = vshrl.u32 %v3632_v37, 16  ;;  %v1222_v54 = vrot.slane %v1221_v43, 4  ;;  %v289_v56 = vrot.slane %v287_v44, 5  ;;  %v293_v57 = vrot.slane %v291_v45, 4  ;;  %v3674_v38 = vld [vmem:[%s3526_s5 + $0x2c] sm:$0x1] }
  0x2c   : > { %3050 = vmatpush3.bf16.msra.mxu1 %v3552_v17  ;;  %v299_v58 = vrot.slane %v297_v46, 5  ;;  %v1217_v61 = vsel %vm3567_vm4, %v1212_v48, %v1216_v26  ;;  %v284_v63 = vor.u32 %v283_v51, %v280_v49  ;;  %v1232_v4 = vshll.u32 %v3632_v37, 16 }
  0x2d   : > { %v1231_v2 = vrot.slane %v1229_v53, 4  ;;  %3325 = vmatprep.subr.msk.bf16.mxu1 %vm472_vm0, %v3642_v47  ;;  %v1227_v17 = vsel %vm3567_vm4, %v1222_v54, %v1226_v34  ;;  %v294_v9 = vor.u32 %v293_v57, %v289_v56  ;;  %v1238_v10 = vshll.u32 %v3646_v52, 16  ;;  %v3686_v53 = vld [vmem:[%s3526_s5 + $0x34] sm:$0xf] }
  0x2e   : > { %v1242_v11 = vshrl.u32 %v3646_v52, 16  ;;  %v2821_v12 = vcombine.low %v1217_v61, %v1227_v17  ;;  %v285_v14 = vrot.slane %v284_v63, 4  ;;  %v1234_v19 = vrot.slane %v1232_v4, 5  ;;  %4547 = vst [vmem:[#allocation3_spill] sm:$0xff] %v3686_v53  ;;  %v3700_v17 = vld [vmem:[%s3526_s5 + $0x30] sm:$0xf] }
  0x2f   : > { %v1248_v20 = vshll.u32 %v3651_v59, 16  ;;  %v295_v22 = vrot.slane %v294_v9, 4  ;;  %v1240_v24 = vrot.slane %v1238_v10, 5  ;;  %v302_v26 = vshrl.u32 %v3657_v5, 16 }
  0x30   : > { %v1244_v25 = vrot.slane %v1242_v11, 4  ;;  %3106 = vmatmul.mubr.msk.bf16.vlgmr.msra.gmra.mrb[0].mxu0 %vm447_vm3, %v2821_v12  ;;  %v290_v29 = vsel %vm3567_vm4, %v285_v14, %v289_v56  ;;  %v1235_v33 = vor.u32 %v1234_v19, %v1231_v2  ;;  %v305_v39 = vshll.u32 %v3657_v5, 16  ;;  %v3696_v2 = vld [vmem:[%s3526_s5 + $0x38] sm:$0x1] }
  0x31   : > { %v1250_v34 = vrot.slane %v1248_v20, 5  ;;  %3122 = vmatpush3.bf16.msra.mxu0 %v3572_v36  ;;  %v300_v41 = vsel %vm3567_vm4, %v295_v22, %v299_v58  ;;  %v304_v44 = vrot.slane %v302_v26, 4  ;;  %v311_v45 = vshll.u32 %v3667_v21, 16  ;;  %v3706_v22 = vld [vmem:[%s3526_s5 + $0x34] sm:$0xf] }
  0x32   : > { %v1245_v43 = vor.u32 %v1244_v25, %v1240_v24  ;;  %v2721_v46 = vcombine.low %v290_v29, %v300_v41  ;;  %v1236_v48 = vrot.slane %v1235_v33, 4  ;;  %v307_v49 = vrot.slane %v305_v39, 5  ;;  %3330 = vmatprep.subr.msk.bf16.mxu0 %vm472_vm0, %v3588_v50  ;;  %v3715_v41 = vld [vmem:[%s3526_s5 + $0x38] sm:$0x1] }
  0x33   : > { %v315_v51 = vshrl.u32 %v3667_v21, 16  ;;  %v313_v54 = vrot.slane %v311_v45, 5  ;;  %v321_v56 = vshll.u32 %v3674_v38, 16  ;;  %v1253_v57 = vshrl.u32 %v3678_v40, 16 }
  0x34   : > { %v1246_v36 = vrot.slane %v1245_v43, 4  ;;  %3037 = vmatprep.mubr.msk.bf16.mxu1 %vm447_vm3, %v2721_v46  ;;  %v1241_v58 = vsel %vm3567_vm4, %v1236_v48, %v1240_v24  ;;  %v308_v61 = vor.u32 %v307_v49, %v304_v44  ;;  %v1256_v4 = vshll.u32 %v3678_v40, 16 }
  0x35   : > { %v317_v63 = vrot.slane %v315_v51, 4  ;;  %v323_v9 = vrot.slane %v321_v56, 5  ;;  %v1255_v10 = vrot.slane %v1253_v57, 4  ;;  %v1262_v11 = vshll.u32 %v3686_v53, 16 }
  0x36   : > { %v1251_v50 = vsel %vm3567_vm4, %v1246_v36, %v1250_v34  ;;  %v309_v14 = vrot.slane %v308_v61, 4  ;;  %v1258_v20 = vrot.slane %v1256_v4, 5  ;;  %v1266_v25 = vshrl.u32 %v3686_v53, 16  ;;  %v3727_v4 = vld [vmem:[%s3526_s5 + $0x40] sm:$0xf] }
  0x37   : > { %v2822_v12 = vcombine.low %v1241_v58, %v1251_v50  ;;  %v318_v19 = vor.u32 %v317_v63, %v313_v54  ;;  %v1264_v24 = vrot.slane %v1262_v11, 5  ;;  %v1272_v26 = vshll.u32 %v3696_v2, 16 }
  0x38   : > { %v326_v29 = vshrl.u32 %v3700_v17, 16  ;;  %v314_v33 = vsel %vm3567_vm4, %v309_v14, %v313_v54  ;;  %v1259_v39 = vor.u32 %v1258_v20, %v1255_v10  ;;  %v329_v43 = vshll.u32 %v3700_v17, 16  ;;  %v3723_v54 = vld [vmem:[%s3526_s5 + $0x3c] sm:$0xf] }
  0x39   : > { %3109 = vmatprep.mubr.msk.bf16.mxu0 %vm447_vm3, %v2822_v12  ;;  %v319_v34 = vrot.slane %v318_v19, 4  ;;  %v1268_v44 = vrot.slane %v1266_v25, 4  ;;  %v1274_v45 = vrot.slane %v1272_v26, 5  ;;  %v335_v48 = vshll.u32 %v3706_v22, 16 }
  0x3a   : > { %v328_v46 = vrot.slane %v326_v29, 4  ;;  %v1260_v51 = vrot.slane %v1259_v39, 4  ;;  %v331_v36 = vrot.slane %v329_v43, 5  ;;  %v339_v56 = vshrl.u32 %v3706_v22, 16  ;;  %v3742_v29 = vld [vmem:[%s3526_s5 + $0x44] sm:$0x1] }
  0x3b   : > { %v324_v49 = vsel %vm3567_vm4, %v319_v34, %v323_v9  ;;  %v1269_v58 = vor.u32 %v1268_v44, %v1264_v24  ;;  %v337_v61 = vrot.slane %v335_v48, 5  ;;  %v345_v63 = vshll.u32 %v3715_v41, 16 }
  0x3c   : > { %v2722_v57 = vcombine.low %v314_v33, %v324_v49  ;;  %v1265_v50 = vsel %vm3567_vm4, %v1260_v51, %v1264_v24  ;;  %v332_v10 = vor.u32 %v331_v36, %v328_v46  ;;  %v341_v11 = vrot.slane %v339_v56, 4 }
  0x3d   : > { %v2836_v12 = vrot.slane %v3542_v13, 9  ;;  %v1270_v14 = vrot.slane %v1269_v58, 4  ;;  %v347_v19 = vrot.slane %v345_v63, 5  ;;  %v1548_v20 = vrot.slane %v3546_v15, 5 }
  0x3e   : > { %3038 = vmatmul.mubr.msk.bf16.gmra.mrb[4].mxu1 %vm447_vm3, %v2722_v57  ;;  %v350_v25 = vshrl.u32 %v3723_v54, 16  ;;  %v333_v26 = vrot.slane %v332_v10, 4  ;;  %v342_v24 = vor.u32 %v341_v11, %v337_v61  ;;  %v353_v33 = vshll.u32 %v3723_v54, 16  ;;  %v3759_v57 = vld [vmem:[%s3526_s5 + $0x48] sm:$0xf] }
  0x3f   : > { %v359_v34 = vshll.u32 %v3727_v4, 16  ;;  %v1275_v13 = vsel %vm3567_vm4, %v1270_v14, %v1274_v45  ;;  %v1549_v39 = vsel %vm3733_vm7, %v2836_v12, %v1548_v20  ;;  %v1550_v43 = vrot.slane %v1548_v20, 4  ;;  %v3776_v20 = vld [vmem:[%s3526_s5 + $0x50] sm:$0x1] }
  0x40   : > { %v352_v15 = vrot.slane %v350_v25, 4  ;;  %v2823_v44 = vcombine.low %v1265_v50, %v1275_v13  ;;  %v338_v46 = vsel %vm3567_vm4, %v333_v26, %v337_v61  ;;  %v343_v48 = vrot.slane %v342_v24, 4  ;;  %v3766_v50 = vld [vmem:[%s3526_s5 + $0x4c] sm:$0xf] }
  0x41   : > { %v355_v49 = vrot.slane %v353_v33, 5  ;;  %v1552_v51 = vsel %vm3733_vm7, %v1550_v43, %v1551_v62  ;;  %v361_v36 = vrot.slane %v359_v34, 5  ;;  %v363_v45 = vshrl.u32 %v3727_v4, 16  ;;  %v3790_v43 = vld [vmem:[%s3526_s5 + $0x54] sm:$0xf] }
  0x42   : > { %v369_v56 = vshll.u32 %v3742_v29, 16  ;;  %3110 = vmatmul.mubr.msk.bf16.gmra.mrb[4].mxu0 %vm447_vm3, %v2823_v44  ;;  %v348_v58 = vsel %vm3567_vm4, %v343_v48, %v347_v19  ;;  %v2845_v61 = vcombine.low %v1549_v39, %v1552_v51  ;;  %v2837_v16 = vrot.slane %v3591_v55, 9 }
  0x43   : > { %v356_v63 = vor.u32 %v355_v49, %v352_v15  ;;  %v2723_v62 = vcombine.low %v338_v46, %v348_v58  ;;  %v365_v10 = vrot.slane %v363_v45, 4  ;;  %v1557_v12 = vrot.slane %v1555_v27, 4  ;;  %v3797_v45 = vld [vmem:[%s3526_s5 + $0x58] sm:$0xf] }
  0x44   : > { %v371_v11 = vrot.slane %v369_v56, 5  ;;  %3123 = vmatprep.mubr.msk.bf16.mxu0 %vm447_vm3, %v2845_v61  ;;  %v1556_v19 = vsel %vm3733_vm7, %v2837_v16, %v1555_v27  ;;  %v374_v55 = vshrl.u32 %v3759_v57, 16  ;;  %v377_v25 = vshll.u32 %v3759_v57, 16  ;;  %v3802_v61 = vld [vmem:[%s3526_s5 + $0x5c] sm:$0x1] }
  0x45   : > { %v357_v14 = vrot.slane %v356_v63, 4  ;;  %3041 = vmatprep.mubr.msk.bf16.mxu1 %vm447_vm3, %v2723_v62  ;;  %v366_v26 = vor.u32 %v365_v10, %v361_v36  ;;  %v1559_v24 = vsel %vm3733_vm7, %v1557_v12, %v1558_v35  ;;  %v383_v60 = vshll.u32 %v3766_v50, 16  ;;  %v3808_v16 = vld [vmem:[%s4517_s1 + $0xe] sm:$0x3] }
  0x46   : > { %v387_v33 = vshrl.u32 %v3766_v50, 16  ;;  %v2846_v34 = vcombine.low %v1556_v19, %v1559_v24  ;;  %v376_v13 = vrot.slane %v374_v55, 4  ;;  %v379_v39 = vrot.slane %v377_v25, 5 }
  0x47   : > { %v362_v27 = vsel %vm3567_vm4, %v357_v14, %v361_v36  ;;  %v367_v15 = vrot.slane %v366_v26, 4  ;;  %v385_v44 = vrot.slane %v383_v60, 5  ;;  %v393_v46 = vshll.u32 %v3776_v20, 16  ;;  %v3824_v26 = vld [vmem:[%s3526_s5 + $0x3c] sm:$0xf] }
  0x48   : > { %v389_v0 = vrot.slane %v387_v33, 4  ;;  %v380_v35 = vor.u32 %v379_v39, %v376_v13  ;;  %v2838_v48 = vrot.slane %v3632_v37, 9  ;;  %v1562_v49 = vrot.slane %v3646_v52, 5  ;;  %v3834_v13 = vld [vmem:[%s3526_s5 + $0x44] sm:$0x1] }
  0x49   : > { %v1565_v51 = vrot.slane %v3651_v59, 5  ;;  %v372_v36 = vsel %vm3567_vm4, %v367_v15, %v371_v11  ;;  %v395_v58 = vrot.slane %v393_v46, 5  ;;  %v398_v63 = vshrl.u32 %v3790_v43, 16  ;;  %4551 = vst [vmem:[#allocation5_spill] sm:$0xff] %v3834_v13 }
  0x4a   : > { %v390_v56 = vor.u32 %v389_v0, %v385_v44  ;;  %v2724_v37 = vcombine.low %v362_v27, %v372_v36  ;;  %3124 = vmatmul.mubr.msk.bf16.vlgmr.msra.gmra.mrb[0].mxu0 %vm447_vm3, %v2846_v34  ;;  %v381_v52 = vrot.slane %v380_v35, 4  ;;  %v1563_v59 = vsel %vm3733_vm7, %v2838_v48, %v1562_v49  ;;  %v3831_v34 = vld [vmem:[%s3526_s5 + $0x40] sm:$0xf] }
  0x4b   : > { %v1564_v62 = vrot.slane %v1562_v49, 4  ;;  %3140 = vmatpush3.bf16.msra.mxu0 %v3606_v1  ;;  %v400_v11 = vrot.slane %v398_v63, 4  ;;  %v401_v12 = vshll.u32 %v3790_v43, 16  ;;  %v407_v14 = vshll.u32 %v3797_v45, 16  ;;  %4550 = vst [vmem:[#allocation4_spill] sm:$0xff] %v3831_v34 }
  0x4c   : > { %v391_v10 = vrot.slane %v390_v56, 4  ;;  %3042 = vmatmul.mubr.msk.bf16.gmra.mrb[8].mxu1 %vm447_vm3, %v2724_v37  ;;  %v386_v19 = vsel %vm3567_vm4, %v381_v52, %v385_v44  ;;  %v411_v25 = vshrl.u32 %v3797_v45, 16  ;;  %v417_v1 = vshll.u32 %v3802_v61, 16  ;;  %3331 = vmatprep.subr.msk.bf16.mxu0 %vm472_vm0, %v3808_v16 }
  0x4d   : > { %v1566_v55 = vsel %vm3733_vm7, %v1564_v62, %v1565_v51  ;;  %v403_v33 = vrot.slane %v401_v12, 5  ;;  %v409_v27 = vrot.slane %v407_v14, 5  ;;  %v2839_v44 = vrot.slane %v3678_v40, 9  ;;  %v3859_v12 = vld [vmem:[%s3526_s5 + $0x50] sm:$0x1] }
  0x4e   : > { %v396_v24 = vsel %vm3567_vm4, %v391_v10, %v395_v58  ;;  %v2847_v60 = vcombine.low %v1563_v59, %v1566_v55  ;;  %v413_v15 = vrot.slane %v411_v25, 4  ;;  %v1569_v46 = vrot.slane %v3686_v53, 5  ;;  %v3853_v10 = vld [vmem:[%s3526_s5 + $0x48] sm:$0xf] }
  0x4f   : > { %v2725_v39 = vcombine.low %v386_v19, %v396_v24  ;;  %v404_v0 = vor.u32 %v403_v33, %v400_v11  ;;  %v1572_v35 = vrot.slane %v3696_v2, 5  ;;  %v2840_v48 = vrot.slane %v3824_v26, 9  ;;  %v3856_v11 = vld [vmem:[%s3526_s5 + $0x4c] sm:$0xf]  ;;  %v3871_v24 = vld [vmem:[%s3526_s5 + $0x58] sm:$0xf] }
  0x50   : > { %3127 = vmatprep.mubr.msk.bf16.mxu0 %vm447_vm3, %v2847_v60  ;;  %v414_v49 = vor.u32 %v413_v15, %v409_v27  ;;  %v419_v51 = vrot.slane %v417_v1, 5  ;;  %v1576_v36 = vrot.slane %v3831_v34, 5  ;;  %v1579_v40 = vrot.slane %v3834_v13, 5  ;;  %v3868_v1 = vld [vmem:[%s3526_s5 + $0x54] sm:$0xf]  ;;  %4553 = vst [vmem:[#allocation7_spill] sm:$0xff] %v3871_v24 }
  0x51   : > { %3045 = vmatprep.mubr.msk.bf16.mxu1 %vm447_vm3, %v2725_v39  ;;  %v405_v56 = vrot.slane %v404_v0, 4  ;;  %v1570_v58 = vsel %vm3733_vm7, %v2839_v44, %v1569_v46  ;;  %v1571_v63 = vrot.slane %v1569_v46, 4  ;;  %v2735_v55 = vcombine.low %v3529_v6, %v3532_v7  ;;  %4552 = vst [vmem:[#allocation6_spill] sm:$0xff] %v3868_v1 }
  0x52   : > { %v415_v2 = vrot.slane %v414_v49, 4  ;;  %v1577_v37 = vsel %vm3733_vm7, %v2840_v48, %v1576_v36  ;;  %v1578_v52 = vrot.slane %v1576_v36, 4  ;;  %v2841_v39 = vrot.slane %v3853_v10, 9  ;;  %v3892_v36 = vld [vmem:[%s3526_s5 + $0x60] sm:$0xf] }
  0x53   : > { %v410_v59 = vsel %vm3567_vm4, %v405_v56, %v409_v27  ;;  %v1573_v62 = vsel %vm3733_vm7, %v1571_v63, %v1572_v35  ;;  %v3874_v27 = vld [vmem:[%s3526_s5 + $0x5c] sm:$0x1]  ;;  %v1583_v15 = vrot.slane %v3856_v11, 5  ;;  %v1586_v44 = vrot.slane %v3859_v12, 5  ;;  %v3885_v35 = vld [vmem:[%s3526_s5 + $0x64] sm:$0xf] }
  0x54   : > { %v420_v14 = vsel %vm3567_vm4, %v415_v2, %v419_v51  ;;  %v2848_v19 = vcombine.low %v1570_v58, %v1573_v62  ;;  %v1580_v25 = vsel %vm3733_vm7, %v1578_v52, %v1579_v40  ;;  %4554 = vst [vmem:[#allocation8_spill] sm:$0xff] %v3874_v27  ;;  %v2842_v0 = vrot.slane %v3868_v1, 9  ;;  %4555 = vst [vmem:[#allocation9_spill] sm:$0xff] %v3885_v35  ;;  %v3895_v40 = vld [vmem:[%s3526_s5 + $0x68] sm:$0x1] }
  0x55   : > { %v2726_v60 = vcombine.low %v410_v59, %v420_v14  ;;  %v2849_v33 = vcombine.low %v1577_v37, %v1580_v25  ;;  %v1590_v46 = vrot.slane %v3871_v24, 5  ;;  %v1584_v48 = vsel %vm3733_vm7, %v2841_v39, %v1583_v15  ;;  %4556 = vst [vmem:[#allocation10_spill] sm:$0xff] %v3892_v36  ;;  %4557 = vst [vmem:[#allocation11_spill] sm:$0xff] %v3895_v40  ;;  %v4093_v24 = vld [vmem:[%s3526_s5 + $0x58] sm:$0xf] }
  0x56   : > { %3128 = vmatmul.mubr.msk.bf16.gmra.mrb[4].mxu0 %vm447_vm3, %v2848_v19  ;;  %v1585_v49 = vrot.slane %v1583_v15, 4  ;;  %v1593_v51 = vrot.slane %v3874_v27, 5  ;;  %v2736_v63 = vcombine.low %v3560_v30, %v3563_v31  ;;  %v1597_v37 = vrot.slane %v3885_v35, 5  ;;  %4564 = vst [vmem:[#allocation17_spill] sm:$0xff] %v4093_v24 }
  0x57   : > { %3046 = vmatmul.mubr.msk.bf16.gmra.mrb[12].mxu1 %vm447_vm3, %v2726_v60  ;;  %3131 = vmatprep.mubr.msk.bf16.mxu0 %vm447_vm3, %v2849_v33  ;;  %v1591_v56 = vsel %vm3733_vm7, %v2842_v0, %v1590_v46  ;;  %v1592_v58 = vrot.slane %v1590_v46, 4  ;;  %v2843_v62 = vrot.slane %v3892_v36, 9  ;;  %v1600_v14 = vrot.slane %v3895_v40, 5  ;;  %v2802_v33 = vld [vmem:[%s4517_s1 + $0x6] sm:$0x3] }
  0x58   : > { %3051 = vmatprep.mubr.msk.bf16.mxu1 %vm447_vm3, %v2735_v55  ;;  %v1587_v2 = vsel %vm3733_vm7, %v1585_v49, %v1586_v44  ;;  %v2737_v19 = vcombine.low %v3614_v18, %v3619_v23  ;;  %v1599_v25 = vrot.slane %v1597_v37, 4  ;;  %v855_v60 = vsel %vm472_vm0, %v3642_v47, 0  ;;  %v3925_v47 = vld [vmem:[%s3526_s5 + $0x18] sm:$0xf]  ;;  %v3928_v0 = vld [vmem:[%s3526_s5 + $0x1c] sm:$0xf] }
  0x59   : > { %v2850_v52 = vcombine.low %v1584_v48, %v1587_v2  ;;  %v1594_v59 = vsel %vm3733_vm7, %v1592_v58, %v1593_v51  ;;  %v757_v39 = vrot.slane %v3563_v31, 5  ;;  %v1598_v15 = vsel %vm3733_vm7, %v2843_v62, %v1597_v37  ;;  %v3946_v37 = vld [vmem:[%s3526_s5 + $0x24] sm:$0xf]  ;;  %v3960_v62 = vld [vmem:[%s3526_s5 + $0x28] sm:$0xf] }
  0x5a   : > { %v2851_v55 = vcombine.low %v1591_v56, %v1594_v59  ;;  %v1601_v44 = vsel %vm3733_vm7, %v1599_v25, %v1600_v14  ;;  %v760_v31 = vrot.slane %v3575_v42, 5  ;;  %v2738_v48 = vcombine.low %v3657_v5, %v3667_v21  ;;  %4558 = vst [vmem:[#allocation12_spill] sm:$0xff] %v3946_v37  ;;  %v4086_v36 = vld [vmem:[%s3526_s5 + $0x54] sm:$0xf] }
  0x5b   : > { %v2852_v46 = vcombine.low %v1598_v15, %v1601_v44  ;;  %v2888_v49 = vcombine.low %v3925_v47, %v3928_v0  ;;  %v2752_v51 = vrot.slane %v3560_v30, 9  ;;  %v759_v56 = vrot.slane %v757_v39, 4  ;;  %4563 = vst [vmem:[#allocation16_spill] sm:$0xff] %v4086_v36 }
  0x5c   : > { %v2739_v58 = vcombine.low %v3700_v17, %v3706_v22  ;;  %v3942_v42 = vsel %vm472_vm0, %v2802_v33, 0  ;;  %v2753_v59 = vrot.slane %v3614_v18, 9  ;;  %v1982_v18 = vshll.u32 %v3925_v47, 16 }
  0x5d   : > { %v3954_v30 = vsel %vm3733_vm7, %v759_v56, %v760_v31  ;;  %v1992_v25 = vshrl.u32 %v3928_v0, 16  ;;  %v2754_v15 = vrot.slane %v3657_v5, 9  ;;  %v771_v44 = vrot.slane %v3667_v21, 5 }
  0x5e   : > { %3132 = vmatmul.mubr.msk.bf16.gmra.mrb[8].mxu0 %vm447_vm3, %v2850_v52  ;;  %v3950_v52 = vsel %vm3733_vm7, %v2752_v51, %v757_v39  ;;  %v3975_v39 = vld [vmem:[%s3526_s5 + $0x30] sm:$0xf]  ;;  %v2889_v31 = vcombine.low %v3946_v37, %v3960_v62  ;;  %v2741_v51 = vcombine.low %v3759_v57, %v3766_v50  ;;  %v788_v2 = vrot.slane %v3742_v29, 5 }
  0x5f   : > { %3052 = vmatmul.mubr.msk.bf16.vlgmr.msra.gmra.mrb[0].mxu1 %vm447_vm3, %v2736_v63  ;;  %3135 = vmatprep.mubr.msk.bf16.mxu0 %vm447_vm3, %v2851_v55  ;;  %v2221_v63 = vsel %vm472_vm0, %v3808_v16, 0  ;;  %v1979_v16 = vshrl.u32 %v3925_v47, 16  ;;  %v767_v55 = vrot.slane %v3626_v28, 5  ;;  %4559 = vst [vmem:[#allocation13_spill] sm:$0xff] %v3975_v39  ;;  %v3999_v5 = vsel %vm3733_vm7, %v2754_v15, %v771_v44 }
  0x60   : > { %3068 = vmatpush3.bf16.msra.mxu1 %v855_v60  ;;  %3055 = vmatprep.mubr.msk.bf16.mxu1 %vm447_vm3, %v2737_v19  ;;  %v764_v19 = vrot.slane %v3619_v23, 5  ;;  %v2740_v60 = vcombine.low %v3723_v54, %v3727_v4  ;;  %v773_v21 = vrot.slane %v771_v44, 4  ;;  %v2016_v44 = vshrl.u32 %v3960_v62, 16 }
  0x61   : > { %3326 = vmatprep.subr.msk.bf16.mxu1 %vm472_vm0, %v2802_v33  ;;  %v750_v33 = vrot.slane %v3532_v7, 5  ;;  %v1988_v7 = vshll.u32 %v3928_v0, 16  ;;  %v2757_v40 = vrot.slane %v3759_v57, 9  ;;  %v795_v1 = vrot.slane %v3776_v20, 5  ;;  %v4099_v57 = vld [vmem:[%s3526_s5 + $0x60] sm:$0xf] }
  0x62   : > { %v3979_v23 = vsel %vm3733_vm7, %v2753_v59, %v764_v19  ;;  %v766_v28 = vrot.slane %v764_v19, 4  ;;  %v2755_v59 = vrot.slane %v3700_v17, 9  ;;  %v778_v19 = vrot.slane %v3706_v22, 5  ;;  %4565 = vst [vmem:[#allocation18_spill] sm:$0xff] %v4099_v57 }
  0x63   : > { %v4074_v29 = vrot.slane %v1988_v7, 5  ;;  %v792_v7 = vrot.slane %v3766_v50, 5  ;;  %v4568_v20 = vshll.u32 %v3946_v37, 16 }
  0x64   : > { %v3995_v56 = vsel %vm3733_vm7, %v766_v28, %v767_v55  ;;  %v2751_v55 = vrot.slane %v3529_v6, 9  ;;  %v752_v28 = vrot.slane %v750_v33, 4  ;;  %v4018_v22 = vsel %vm3733_vm7, %v2755_v59, %v778_v19  ;;  %v4034_v59 = vld [vmem:[%s3526_s5 + $0x3c] sm:$0xf] }
  0x65   : > { %v2027_v6 = vshrl.u32 %v3975_v39, 16  ;;  %4560 = vst [vmem:[#allocation14_spill] sm:$0xff] %v4034_v59  ;;  %v4109_v35 = vsel %vm3733_vm7, %v2757_v40, %v792_v7 }
  0x66   : > { %3136 = vmatmul.mubr.msk.bf16.gmra.mrb[12].mxu0 %vm447_vm3, %v2852_v46  ;;  %v785_v46 = vrot.slane %v3727_v4, 5  ;;  %v4058_v4 = vld [vmem:[%s3526_s5 + $0x4c] sm:$0xf] }
  0x67   : > { %3056 = vmatmul.mubr.msk.bf16.gmra.mrb[4].mxu1 %vm447_vm3, %v2738_v48  ;;  %3141 = vmatprep.mubr.msk.bf16.mxu0 %vm447_vm3, %v2888_v49  ;;  %v3988_v48 = vld [vmem:[%s3526_s5 + $0x34] sm:$0xf]  ;;  %v774_v49 = vrot.slane %v3674_v38, 5  ;;  %v781_v38 = vrot.slane %v3715_v41, 5  ;;  %v780_v41 = vrot.slane %v778_v19, 4 }
  0x68   : > { %3059 = vmatprep.mubr.msk.bf16.mxu1 %vm447_vm3, %v2739_v58  ;;  %v2890_v14 = vcombine.low %v3975_v39, %v3988_v48  ;;  %v2030_v58 = vshll.u32 %v3975_v39, 16  ;;  %v4037_v19 = vld [vmem:[%s3526_s5 + $0x40] sm:$0xf] }
  0x69   : > { %v4011_v15 = vsel %vm3733_vm7, %v773_v21, %v774_v49  ;;  %v4027_v49 = vld [vmem:[%s4517_s1 + $0x10] sm:$0x3]  ;;  %v2756_v21 = vrot.slane %v3723_v54, 9  ;;  %v4041_v17 = vsel %vm3733_vm7, %v780_v41, %v781_v38  ;;  %v2040_v54 = vshrl.u32 %v3988_v48, 16  ;;  %v4055_v41 = vld [vmem:[%s3526_s5 + $0x48] sm:$0xf] }
  0x6a   : > { %4562 = vst [vmem:[#allocation15_spill] sm:$0xff] %v4055_v41 }
  0x6e   : > { %3142 = vmatmul.mubr.msk.bf16.vlgmr.msra.gmra.mrb[0].mxu0 %vm447_vm3, %v2889_v31  ;;  %v2742_v31 = vcombine.low %v3790_v43, %v3797_v45 }
  0x6f   : > { %3060 = vmatmul.mubr.msk.bf16.gmra.mrb[8].mxu1 %vm447_vm3, %v2740_v60  ;;  %3158 = vmatpush3.bf16.msra.mxu0 %v2221_v63  ;;  %v751_v63 = vsel %vm3733_vm7, %v2751_v55, %v750_v33  ;;  %v4561_v60 = vrot.slane %v3535_v8, 5  ;;  %v4066_v33 = vsel %vm3733_vm7, %v2756_v21, %v785_v46  ;;  %v787_v8 = vrot.slane %v785_v46, 4 }
  0x70   : > { %3063 = vmatprep.mubr.msk.bf16.mxu1 %vm447_vm3, %v2741_v51  ;;  %3145 = vmatprep.mubr.msk.bf16.mxu0 %vm447_vm3, %v2890_v14  ;;  %v1981_v51 = vrot.slane %v1979_v16, 4  ;;  %v1984_v14 = vrot.slane %v1982_v18, 5  ;;  %v2891_v55 = vcombine.low %v4034_v59, %v4037_v19  ;;  %v1994_v16 = vrot.slane %v1992_v25, 4 }
  0x71   : > { %v754_v38 = vsel %vm3733_vm7, %v752_v28, %v4561_v60  ;;  %3332 = vmatprep.subr.msk.bf16.mxu0 %vm472_vm0, %v4027_v49  ;;  %v4072_v60 = vld [vmem:[%s3526_s5 + $0x20] sm:$0x1]  ;;  %v2892_v18 = vcombine.low %v4055_v41, %v4058_v4  ;;  %v4080_v21 = vsel %vm3733_vm7, %v787_v8, %v788_v2  ;;  %v2012_v46 = vshll.u32 %v3960_v62, 16 }
  0x72   : > { %v2760_v27 = vcombine.low %v751_v63, %v754_v38  ;;  %v1985_v2 = vor.u32 %v1984_v14, %v1981_v51  ;;  %v1998_v8 = vshll.u32 %v4072_v60, 16  ;;  %v4102_v63 = vld [vmem:[%s3526_s5 + $0x64] sm:$0xf]  ;;  %v1995_v38 = vor.u32 %v1994_v16, %v4074_v29 }
  0x73   : > { %4566 = vst [vmem:[#allocation19_spill] sm:$0xff] %v4102_v63  ;;  %v4567_v25 = vshrl.u32 %v3946_v37, 16  ;;  %v794_v51 = vrot.slane %v792_v7, 4  ;;  %v2008_v14 = vrot.slane %v4568_v20, 5  ;;  %v2018_v16 = vrot.slane %v2016_v44, 4 }
  0x74   : > { %v2036_v28 = vshll.u32 %v3988_v48, 16  ;;  %v2032_v7 = vrot.slane %v2030_v58, 5  ;;  %v2894_v44 = vcombine.low %v4099_v57, %v4102_v63  ;;  %v802_v20 = vrot.slane %v3802_v61, 5 }
  0x75   : > { %v2005_v50 = vrot.slane %v4567_v25, 4  ;;  %v4121_v40 = vsel %vm3733_vm7, %v794_v51, %v795_v1  ;;  %v2029_v25 = vrot.slane %v2027_v6, 4  ;;  %v799_v1 = vrot.slane %v3797_v45, 5  ;;  %v4135_v6 = vld [vmem:[%s3526_s5 + $0x38] sm:$0x1] }
  0x76   : > { %3146 = vmatmul.mubr.msk.bf16.gmra.mrb[4].mxu0 %vm447_vm3, %v2891_v55  ;;  %v4115_v55 = vrot.slane %v2012_v46, 5  ;;  %v4129_v46 = vld [vmem:[%s3526_s5 + $0x2c] sm:$0x1]  ;;  %v1986_v51 = vrot.slane %v1985_v2, 4  ;;  %v4137_v58 = vrot.slane %v2036_v28, 5  ;;  %v1996_v13 = vrot.slane %v1995_v38, 4 }
  0x77   : > { %3064 = vmatmul.mubr.msk.bf16.gmra.mrb[12].mxu1 %vm447_vm3, %v2742_v31  ;;  %3149 = vmatprep.mubr.msk.bf16.mxu0 %vm447_vm3, %v2892_v18  ;;  %v2758_v31 = vrot.slane %v3790_v43, 9  ;;  %v2893_v18 = vcombine.low %v4086_v36, %v4093_v24  ;;  %v2042_v43 = vrot.slane %v2040_v54, 4  ;;  %v2000_v39 = vrot.slane %v1998_v8, 5 }
  0x78   : > { %3069 = vmatprep.mubr.msk.bf16.mxu1 %vm447_vm3, %v2760_v27  ;;  %v801_v53 = vrot.slane %v799_v1, 4  ;;  %v4148_v27 = vld [vmem:[%s3526_s5 + $0x70] sm:$0xf]  ;;  %v2009_v45 = vor.u32 %v2008_v14, %v2005_v50  ;;  %v2019_v2 = vor.u32 %v2018_v16, %v4115_v55  ;;  %v2022_v28 = vshll.u32 %v4129_v46, 16 }
  0x79   : > { %v4142_v37 = vsel %vm3733_vm7, %v2758_v31, %v799_v1  ;;  %v2033_v34 = vor.u32 %v2032_v7, %v2029_v25  ;;  %v2075_v54 = vshrl.u32 %v4055_v41, 16  ;;  %v2078_v61 = vshll.u32 %v4055_v41, 16 }
  0x7a   : > { %v2046_v8 = vshll.u32 %v4135_v6, 16  ;;  %v4157_v38 = vsel %vm3733_vm7, %v801_v53, %v802_v20  ;;  %v2088_v31 = vshrl.u32 %v4058_v4, 16  ;;  %v2043_v50 = vor.u32 %v2042_v43, %v4137_v58 }
  0x7b   : > { %v2060_v16 = vshll.u32 %v4037_v19, 16  ;;  %v4570_v25 = vcombine.low %v3950_v52, %v3954_v30  ;;  %v2895_v53 = vcombine.low %v4145_v3, %v4148_v27  ;;  %v1991_v7 = vsel %vm3567_vm4, %v1986_v51, %v4074_v29 }
  0x7c   : > { %v2084_v1 = vshll.u32 %v4058_v4, 16  ;;  %v4571_v52 = vcombine.low %v3979_v23, %v3995_v56  ;;  %v2010_v30 = vrot.slane %v2009_v45, 4  ;;  %v2024_v43 = vrot.slane %v2022_v28, 5  ;;  %v4194_v56 = vld [vmem:[%s3526_s5 + $0x44] sm:$0x1] }
  0x7d   : > { %v2034_v20 = vrot.slane %v2033_v34, 4  ;;  %v4572_v29 = vshrl.u32 %v4034_v59, 16  ;;  %v4573_v14 = vshll.u32 %v4034_v59, 16  ;;  %v2044_v23 = vrot.slane %v2043_v50, 4  ;;  %v4207_v59 = vld [vmem:[%s3526_s5 + $0x50] sm:$0x1] }
  0x7e   : > { %3150 = vmatmul.mubr.msk.bf16.gmra.mrb[8].mxu0 %vm447_vm3, %v2893_v18  ;;  %v2001_v18 = vsel %vm3567_vm4, %v1996_v13, %v2000_v39  ;;  %v4574_v39 = vshrl.u32 %v4037_v19, 16  ;;  %v4196_v34 = vrot.slane %v2060_v16, 5  ;;  %v2077_v45 = vrot.slane %v2075_v54, 4 }
  0x7f   : > { %3070 = vmatmul.mubr.msk.bf16.vlgmr.msra.gmra.mrb[0].mxu1 %vm447_vm3, %v4570_v25  ;;  %3153 = vmatprep.mubr.msk.bf16.mxu0 %vm447_vm3, %v2894_v44  ;;  %v2020_v44 = vrot.slane %v2019_v2, 4  ;;  %v2048_v25 = vrot.slane %v2046_v8, 5  ;;  %v2053_v51 = vrot.slane %v4572_v29, 4  ;;  %v2056_v13 = vrot.slane %v4573_v14, 5 }
  0x80   : > { %3086 = vmatpush3.bf16.msra.mxu1 %v3942_v42  ;;  %3073 = vmatprep.mubr.msk.bf16.mxu1 %vm447_vm3, %v4571_v52  ;;  %v2066_v41 = vrot.slane %v4574_v39, 4  ;;  %v3398_v42 = vld [vmem:[%s4517_s1 + $0x8] sm:$0x3]  ;;  %v2080_v2 = vrot.slane %v2078_v61, 5  ;;  %v2905_v28 = vcombine.low %v1991_v7, %v2001_v18  ;;  %v2451_v8 = vsel %vm472_vm0, %v4027_v49, 0 }
  0x81   : > { %3328 = vmatprep.subr.msk.bf16.mxu1 %vm472_vm0, %v3398_v42  ;;  %v4200_v14 = vrot.slane %v2084_v1, 5  ;;  %v2090_v52 = vrot.slane %v2088_v31, 4  ;;  %v2099_v29 = vshrl.u32 %v4086_v36, 16  ;;  %v2102_v39 = vshll.u32 %v4086_v36, 16  ;;  %v4240_v36 = vld [vmem:[%s3526_s5 + $0x5c] sm:$0x1] }
  0x82   : > { %v2112_v42 = vshrl.u32 %v4093_v24, 16  ;;  %v2123_v50 = vshrl.u32 %v4099_v57, 16  ;;  %v2015_v54 = vsel %vm3567_vm4, %v2010_v30, %v4115_v55  ;;  %v2025_v49 = vsel %vm3567_vm4, %v2020_v44, %v2024_v43 }
  0x83   : > { %v2057_v61 = vor.u32 %v2056_v13, %v2053_v51  ;;  %v2070_v31 = vshll.u32 %v4194_v56, 16  ;;  %v2039_v16 = vsel %vm3567_vm4, %v2034_v20, %v4137_v58  ;;  %v2049_v7 = vsel %vm3567_vm4, %v2044_v23, %v2048_v25 }
  0x84   : > { %v2067_v18 = vor.u32 %v2066_v41, %v4196_v34  ;;  %v2081_v1 = vor.u32 %v2080_v2, %v2077_v45  ;;  %v2126_v55 = vshll.u32 %v4099_v57, 16  ;;  %v4575_v30 = vcombine.low %v3999_v5, %v4011_v15 }
  0x85   : > { %v2094_v44 = vshll.u32 %v4207_v59, 16  ;;  %v2108_v58 = vshll.u32 %v4093_v24, 16  ;;  %v2136_v43 = vshrl.u32 %v4102_v63, 16  ;;  %v2147_v41 = vshrl.u32 %v4145_v3, 16 }
  0x86   : > { %3154 = vmatmul.mubr.msk.bf16.gmra.mrb[12].mxu0 %vm447_vm3, %v2895_v53  ;;  %v2091_v53 = vor.u32 %v2090_v52, %v4200_v14  ;;  %v2150_v20 = vshll.u32 %v4145_v3, 16  ;;  %v4576_v5 = vcombine.low %v4018_v22, %v4041_v17  ;;  %v2132_v15 = vshll.u32 %v4102_v63, 16  ;;  %v4245_v22 = vld [vmem:[%s3526_s5 + $0x68] sm:$0x1] }
  0x87   : > { %3074 = vmatmul.mubr.msk.bf16.gmra.mrb[4].mxu1 %vm447_vm3, %v4575_v30  ;;  %3159 = vmatprep.mubr.msk.bf16.mxu0 %vm447_vm3, %v2905_v28  ;;  %v2906_v25 = vcombine.low %v2015_v54, %v2025_v49  ;;  %v2907_v51 = vcombine.low %v2039_v16, %v2049_v7  ;;  %v2058_v13 = vrot.slane %v2057_v61, 4  ;;  %v2072_v23 = vrot.slane %v2070_v31, 5 }
  0x88   : > { %3077 = vmatprep.mubr.msk.bf16.mxu1 %vm447_vm3, %v4576_v5  ;;  %v2068_v45 = vrot.slane %v2067_v18, 4  ;;  %v2082_v2 = vrot.slane %v2081_v1, 4  ;;  %v2101_v28 = vrot.slane %v2099_v29, 4  ;;  %v2104_v52 = vrot.slane %v2102_v39, 5 }
  0x89   : > { %v2092_v30 = vrot.slane %v2091_v53, 4  ;;  %v2096_v57 = vrot.slane %v2094_v44, 5  ;;  %v4242_v3 = vrot.slane %v2108_v58, 5  ;;  %v2114_v17 = vrot.slane %v2112_v42, 4 }
  0x8a   : > { %v2125_v5 = vrot.slane %v2123_v50, 4  ;;  %v2128_v24 = vrot.slane %v2126_v55, 5  ;;  %v4247_v63 = vrot.slane %v2132_v15, 5  ;;  %v2138_v54 = vrot.slane %v2136_v43, 4  ;;  %v3399_v15 = vld [vmem:[%s3526_s5 + $0xc] sm:$0xf] }
  0x8b   : > { %v2160_v49 = vshrl.u32 %v4148_v27, 16  ;;  %v2063_v29 = vsel %vm3567_vm4, %v2058_v13, %v4196_v34  ;;  %v2156_v39 = vshll.u32 %v4148_v27, 16  ;;  %v2073_v42 = vsel %vm3567_vm4, %v2068_v45, %v2072_v23 }
  0x8c   : > { %v2087_v50 = vsel %vm3567_vm4, %v2082_v2, %v4200_v14  ;;  %v2105_v61 = vor.u32 %v2104_v52, %v2101_v28  ;;  %v2118_v31 = vshll.u32 %v4240_v36, 16  ;;  %v4577_v16 = vcombine.low %v4066_v33, %v4080_v21 }
  0x8d   : > { %v2097_v34 = vsel %vm3567_vm4, %v2092_v30, %v2096_v57  ;;  %v2115_v7 = vor.u32 %v2114_v17, %v4242_v3  ;;  %v2142_v18 = vshll.u32 %v4245_v22, 16  ;;  %v2808_v14 = vcombine.low %v3853_v10, %v3856_v11 }
  0x8e   : > { %3160 = vmatmul.mubr.msk.bf16.vlgmr.msra.gmra.mrb[0].mxu0 %vm447_vm3, %v2906_v25  ;;  %v4578_v1 = vcombine.low %v4109_v35, %v4121_v40  ;;  %v2129_v33 = vor.u32 %v2128_v24, %v2125_v5  ;;  %v2139_v21 = vor.u32 %v2138_v54, %v4247_v63  ;;  %v2149_v57 = vrot.slane %v2147_v41, 4  ;;  %v3400_v25 = vld [vmem:[%s3526_s5 + $0x10] sm:$0xf]  ;;  %v4286_v24 = vld [vmem:[%s3526_s5 + $0x74] sm:$0x1] }
  0x8f   : > { %3078 = vmatmul.mubr.msk.bf16.gmra.mrb[8].mxu1 %vm447_vm3, %v4577_v16  ;;  %3176 = vmatpush3.bf16.msra.mxu0 %v2451_v8  ;;  %v2152_v8 = vrot.slane %v2150_v20, 5  ;;  %v1301_v55 = vshrl.u32 %v3853_v10, 16  ;;  %v1304_v53 = vshll.u32 %v3853_v10, 16  ;;  %v4279_v44 = vrot.slane %v2156_v39, 5 }
  0x90   : > { %3081 = vmatprep.mubr.msk.bf16.mxu1 %vm447_vm3, %v4578_v1  ;;  %3163 = vmatprep.mubr.msk.bf16.mxu0 %vm447_vm3, %v2907_v51  ;;  %v2162_v58 = vrot.slane %v2160_v49, 4  ;;  %v1310_v43 = vshll.u32 %v3856_v11, 16  ;;  %v1314_v35 = vshrl.u32 %v3856_v11, 16  ;;  %v2908_v40 = vcombine.low %v2063_v29, %v2073_v42  ;;  %v3401_v1 = vld [vmem:[%s3526_s5 + $0x18] sm:$0xf] }
  0x91   : > { %v2803_v51 = vcombine.low %v3399_v15, %v3400_v25  ;;  %v2909_v13 = vcombine.low %v2087_v50, %v2097_v34  ;;  %v2106_v41 = vrot.slane %v2105_v61, 4  ;;  %v2116_v20 = vrot.slane %v2115_v7, 4 }
  0x92   : > { %v2120_v23 = vrot.slane %v2118_v31, 5  ;;  %v2130_v45 = vrot.slane %v2129_v33, 4  ;;  %v2140_v2 = vrot.slane %v2139_v21, 4  ;;  %v2144_v28 = vrot.slane %v2142_v18, 5  ;;  %v3402_v33 = vld [vmem:[%s3526_s5 + $0x1c] sm:$0xf] }
  0x93   : > { %v2153_v52 = vor.u32 %v2152_v8, %v2149_v57  ;;  %v2163_v30 = vor.u32 %v2162_v58, %v4279_v44  ;;  %v2166_v17 = vshll.u32 %v4286_v24, 16  ;;  %v1303_v5 = vrot.slane %v1301_v55, 4 }
  0x94   : > { %v1306_v54 = vrot.slane %v1304_v53, 5  ;;  %v2346_v49 = vrot.slane %v3928_v0, 5  ;;  %v1312_v29 = vrot.slane %v1310_v43, 5  ;;  %v1320_v39 = vshll.u32 %v3859_v12, 16  ;;  %v3404_v53 = vld [vmem:[%s3526_s5 + $0x28] sm:$0xf] }
  0x95   : > { %v4579_v42 = vcombine.low %v4142_v37, %v4157_v38  ;;  %v2111_v50 = vsel %vm3567_vm4, %v2106_v41, %v4242_v3  ;;  %v2121_v61 = vsel %vm3567_vm4, %v2116_v20, %v2120_v23  ;;  %v1316_v0 = vrot.slane %v1314_v35, 4  ;;  %v4580_v20 = vld [vmem:[#allocation4_spill] sm:$0xff] }
  0x96   : > { %3164 = vmatmul.mubr.msk.bf16.gmra.mrb[4].mxu0 %vm447_vm3, %v2908_v40  ;;  %v2135_v12 = vsel %vm3567_vm4, %v2130_v45, %v4247_v63  ;;  %v2145_v37 = vsel %vm3567_vm4, %v2140_v2, %v2144_v28  ;;  %v2154_v38 = vrot.slane %v2153_v52, 4  ;;  %v2164_v31 = vrot.slane %v2163_v30, 4  ;;  %v3403_v63 = vld [vmem:[%s3526_s5 + $0x24] sm:$0xf]  ;;  %v4582_v28 = vld [vmem:[#allocation3_spill] sm:$0xff]  ;;  %v4583_v30 = vld [vmem:[#allocation12_spill] sm:$0xff] }
  0x97   : > { %3082 = vmatmul.mubr.msk.bf16.gmra.mrb[12].mxu1 %vm447_vm3, %v4579_v42  ;;  %3167 = vmatprep.mubr.msk.bf16.mxu0 %vm447_vm3, %v2909_v13  ;;  %v2168_v16 = vrot.slane %v2166_v17, 5  ;;  %v2921_v3 = vrot.slane %v3925_v47, 9  ;;  %v2910_v34 = vcombine.low %v2111_v50, %v2121_v61  ;;  %v2348_v7 = vrot.slane %v2346_v49, 4  ;;  %v4581_v2 = vld [vmem:[#allocation2_spill] sm:$0xff] }
  0x98   : > { %3087 = vmatprep.mubr.msk.bf16.mxu1 %vm447_vm3, %v2803_v51  ;;  %v2349_v18 = vrot.slane %v4072_v60, 5  ;;  %v2804_v21 = vcombine.low %v3401_v1, %v3402_v33  ;;  %v2911_v57 = vcombine.low %v2135_v12, %v2145_v37  ;;  %v1307_v8 = vor.u32 %v1306_v54, %v1303_v5 }
  0x99   : > { %v1322_v55 = vrot.slane %v1320_v39, 5  ;;  %v2805_v58 = vcombine.low %v3403_v63, %v3404_v53  ;;  %v2159_v43 = vsel %vm3567_vm4, %v2154_v38, %v4279_v44  ;;  %v1317_v35 = vor.u32 %v1316_v0, %v1312_v29  ;;  %v4584_v39 = vld [vmem:[#allocation13_spill] sm:$0xff]  ;;  %v4587_v53 = vld [vmem:[#allocation6_spill] sm:$0xff] }
  0x9a   : > { %v2169_v47 = vsel %vm3567_vm4, %v2164_v31, %v2168_v16  ;;  %v2347_v60 = vsel %vm3733_vm7, %v2921_v3, %v2346_v49  ;;  %v2353_v40 = vrot.slane %v3960_v62, 5  ;;  %v1308_v15 = vrot.slane %v1307_v8, 4 }
  0x9b   : > { %v2350_v25 = vsel %vm3733_vm7, %v2348_v7, %v2349_v18  ;;  %v2360_v51 = vrot.slane %v3988_v48, 5  ;;  %v1277_v44 = vshrl.u32 %v3824_v26, 16  ;;  %v1318_v13 = vrot.slane %v1317_v35, 4  ;;  %v3405_v48 = vld [vmem:[%s3526_s5 + $0x30] sm:$0xf]  ;;  %v4585_v18 = vld [vmem:[#allocation5_spill] sm:$0xff] }
  0x9c   : > { %v1280_v41 = vshll.u32 %v3824_v26, 16  ;;  %v1286_v23 = vshll.u32 %v4580_v20, 16  ;;  %v1290_v62 = vshrl.u32 %v4580_v20, 16  ;;  %v1313_v45 = vsel %vm3567_vm4, %v1308_v15, %v1312_v29  ;;  %v4588_v35 = vld [vmem:[#allocation7_spill] sm:$0xff] }
  0x9d   : > { %v2806_v52 = vcombine.low %v3405_v48, %v4582_v28  ;;  %v2922_v17 = vrot.slane %v4583_v30, 9  ;;  %v1323_v5 = vsel %vm3567_vm4, %v1318_v13, %v1322_v55  ;;  %v2355_v54 = vrot.slane %v2353_v40, 4  ;;  %v4586_v55 = vld [vmem:[#allocation14_spill] sm:$0xff] }
  0x9e   : > { %3168 = vmatmul.mubr.msk.bf16.gmra.mrb[8].mxu0 %vm447_vm3, %v2910_v34  ;;  %v2356_v49 = vrot.slane %v4129_v46, 5  ;;  %v2923_v42 = vrot.slane %v4584_v39, 9  ;;  %v4344_v50 = vcombine.low %v1313_v45, %v1323_v5  ;;  %v2912_v29 = vcombine.low %v2159_v43, %v2169_v47  ;;  %v4592_v5 = vld [vmem:[#allocation17_spill] sm:$0xff] }
  0x9f   : > { %3088 = vmatmul.mubr.msk.bf16.vlgmr.msra.gmra.mrb[0].mxu1 %vm447_vm3, %v2804_v21  ;;  %3171 = vmatprep.mubr.msk.bf16.mxu0 %vm447_vm3, %v2911_v57  ;;  %v2930_v61 = vcombine.low %v2347_v60, %v2350_v25  ;;  %v2362_v0 = vrot.slane %v2360_v51, 4  ;;  %v2363_v12 = vrot.slane %v4135_v6, 5  ;;  %v1279_v37 = vrot.slane %v1277_v44, 4 }
  0xa0   : > { %3194 = vmatpush3.bf16.msra.mxu1 %v4581_v2  ;;  %3091 = vmatprep.mubr.msk.bf16.mxu1 %vm447_vm3, %v2805_v58  ;;  %v1282_v38 = vrot.slane %v1280_v41, 5  ;;  %v1288_v31 = vrot.slane %v1286_v23, 5  ;;  %v1292_v16 = vrot.slane %v1290_v62, 4  ;;  %v2807_v3 = vcombine.low %v3824_v26, %v4580_v20  ;;  %v4590_v23 = vld [vmem:[#allocation9_spill] sm:$0xff]  ;;  %v4591_v62 = vld [vmem:[#allocation10_spill] sm:$0xff] }
  0xa1   : > { %v2354_v34 = vsel %vm3733_vm7, %v2922_v17, %v2353_v40  ;;  %v2357_v46 = vsel %vm3733_vm7, %v2355_v54, %v2356_v49  ;;  %v2361_v7 = vsel %vm3733_vm7, %v2923_v42, %v2360_v51  ;;  %v2367_v6 = vrot.slane %v4037_v19, 5  ;;  %v4589_v51 = vld [vmem:[#allocation15_spill] sm:$0xff] }
  0xa2   : > { %v1296_v1 = vshll.u32 %v4585_v18, 16  ;;  %v2364_v26 = vsel %vm3733_vm7, %v2362_v0, %v2363_v12  ;;  %v1283_v33 = vor.u32 %v1282_v38, %v1279_v37  ;;  %v1293_v21 = vor.u32 %v1292_v16, %v1288_v31 }
  0xa3   : > { %v2374_v57 = vrot.slane %v4058_v4, 5  ;;  %v2931_v8 = vcombine.low %v2354_v34, %v2357_v46  ;;  %v2924_v63 = vrot.slane %v4586_v55, 9  ;;  %v2370_v19 = vrot.slane %v4194_v56, 5  ;;  %v4595_v34 = vld [vmem:[#allocation16_spill] sm:$0xff] }
  0xa4   : > { %v1325_v58 = vshrl.u32 %v4587_v53, 16  ;;  %v1328_v43 = vshll.u32 %v4587_v53, 16  ;;  %v1334_v47 = vshll.u32 %v4588_v35, 16  ;;  %v1338_v60 = vshrl.u32 %v4588_v35, 16 }
  0xa5   : > { %v2932_v40 = vcombine.low %v2361_v7, %v2364_v26  ;;  %v2369_v15 = vrot.slane %v2367_v6, 4  ;;  %v1298_v25 = vrot.slane %v1296_v1, 5  ;;  %v2925_v4 = vrot.slane %v4589_v51, 9  ;;  %v4596_v1 = vld [vmem:[#allocation18_spill] sm:$0xff] }
  0xa6   : > { %3172 = vmatmul.mubr.msk.bf16.gmra.mrb[12].mxu0 %vm447_vm3, %v2912_v29  ;;  %v1284_v44 = vrot.slane %v1283_v33, 4  ;;  %v1294_v13 = vrot.slane %v1293_v21, 4  ;;  %v2376_v41 = vrot.slane %v2374_v57, 4  ;;  %v2377_v20 = vrot.slane %v4207_v59, 5  ;;  %v4593_v29 = vld [vmem:[#allocation19_spill] sm:$0xff] }
  0xa7   : > { %3092 = vmatmul.mubr.msk.bf16.gmra.mrb[4].mxu1 %vm447_vm3, %v2806_v52  ;;  %3177 = vmatprep.mubr.msk.bf16.mxu0 %vm447_vm3, %v2930_v61  ;;  %v2809_v56 = vcombine.low %v4587_v53, %v4588_v35  ;;  %v2810_v45 = vcombine.low %v4591_v62, %v4590_v23  ;;  %v1327_v2 = vrot.slane %v1325_v58, 4  ;;  %v1330_v48 = vrot.slane %v1328_v43, 5 }
  0xa8   : > { %3095 = vmatprep.mubr.msk.bf16.mxu1 %vm447_vm3, %v2807_v3  ;;  %v1336_v28 = vrot.slane %v1334_v47, 5  ;;  %v1340_v52 = vrot.slane %v1338_v60, 4  ;;  %v2368_v30 = vsel %vm3733_vm7, %v2924_v63, %v2367_v6  ;;  %v2371_v17 = vsel %vm3733_vm7, %v2369_v15, %v2370_v19  ;;  %v4597_v15 = vld [vmem:[#allocation11_spill] sm:$0xff] }
  0xa9   : > { %v2375_v59 = vsel %vm3733_vm7, %v2925_v4, %v2374_v57  ;;  %v2381_v54 = vrot.slane %v4592_v5, 5  ;;  %v1289_v49 = vsel %vm3567_vm4, %v1284_v44, %v1288_v31  ;;  %v1299_v39 = vsel %vm3567_vm4, %v1294_v13, %v1298_v25  ;;  %v4594_v31 = vld [vmem:[#allocation8_spill] sm:$0xff] }
  0xaa   : > { %v2378_v42 = vsel %vm3733_vm7, %v2376_v41, %v2377_v20  ;;  %v2388_v61 = vrot.slane %v4593_v29, 5  ;;  %v1349_v0 = vshrl.u32 %v4591_v62, 16  ;;  %v1352_v10 = vshll.u32 %v4591_v62, 16  ;;  %v4598_v41 = vld [vmem:[#allocation20_spill] sm:$0xff]  ;;  %v4446_v29 = vld [vmem:[%s4518_s2] ss:$0 sm:$0xff] }
  0xab   : > { %v1358_v11 = vshll.u32 %v4590_v23, 16  ;;  %v2933_v12 = vcombine.low %v2368_v30, %v2371_v17  ;;  %v1331_v37 = vor.u32 %v1330_v48, %v1327_v2  ;;  %v1341_v38 = vor.u32 %v1340_v52, %v1336_v28 }
  0xac   : > { %v1344_v16 = vshll.u32 %v4594_v31, 16  ;;  %v2934_v3 = vcombine.low %v2375_v59, %v2378_v42  ;;  %v2926_v46 = vrot.slane %v4595_v34, 9  ;;  %v2383_v7 = vrot.slane %v2381_v54, 4 }
  0xad   : > { %v2384_v6 = vrot.slane %v4240_v36, 5  ;;  %v2824_v18 = vcombine.low %v1289_v49, %v1299_v39  ;;  %v2927_v26 = vrot.slane %v4596_v1, 9  ;;  %v2390_v33 = vrot.slane %v2388_v61, 4 }
  0xae   : > { %3178 = vmatmul.mubr.msk.bf16.vlgmr.msra.gmra.mrb[0].mxu0 %vm447_vm3, %v2931_v8  ;;  %v2391_v21 = vrot.slane %v4245_v22, 5  ;;  %v1351_v57 = vrot.slane %v1349_v0, 4  ;;  %v1354_v8 = vrot.slane %v1352_v10, 5  ;;  %v1360_v55 = vrot.slane %v1358_v11, 5 }
  0xaf   : > { %3096 = vmatmul.mubr.msk.bf16.gmra.mrb[8].mxu1 %vm447_vm3, %v2808_v14  ;;  %3181 = vmatprep.mubr.msk.bf16.mxu0 %vm447_vm3, %v2932_v40  ;;  %v1362_v14 = vshrl.u32 %v4590_v23, 16  ;;  %v1332_v19 = vrot.slane %v1331_v37, 4  ;;  %v1342_v53 = vrot.slane %v1341_v38, 4  ;;  %v1346_v58 = vrot.slane %v1344_v16, 5 }
  0xb0   : > { %3099 = vmatprep.mubr.msk.bf16.mxu1 %vm447_vm3, %v2809_v56  ;;  %v2382_v36 = vsel %vm3733_vm7, %v2926_v46, %v2381_v54  ;;  %v2385_v43 = vsel %vm3733_vm7, %v2383_v7, %v2384_v6  ;;  %v2389_v22 = vsel %vm3733_vm7, %v2927_v26, %v2388_v61  ;;  %v2395_v35 = vrot.slane %v4148_v27, 5 }
  0xb1   : > { %v1364_v63 = vrot.slane %v1362_v14, 4  ;;  %v2392_v47 = vsel %vm3733_vm7, %v2390_v33, %v2391_v21  ;;  %v1355_v60 = vor.u32 %v1354_v8, %v1351_v57  ;;  %v1368_v25 = vshll.u32 %v4597_v15, 16 }
  0xb2   : > { %v1337_v51 = vsel %vm3567_vm4, %v1332_v19, %v1336_v28  ;;  %v1347_v4 = vsel %vm3567_vm4, %v1342_v53, %v1346_v58  ;;  %v2935_v44 = vcombine.low %v2382_v36, %v2385_v43  ;;  %v2936_v13 = vcombine.low %v2389_v22, %v2392_v47 }
  0xb3   : > { %v1365_v40 = vor.u32 %v1364_v63, %v1360_v55  ;;  %v2928_v20 = vrot.slane %v4598_v41, 9  ;;  %v2397_v27 = vrot.slane %v2395_v35, 4  ;;  %v2398_v56 = vrot.slane %v4286_v24, 5 }
  0xb4   : > { %v2826_v23 = vcombine.low %v1337_v51, %v1347_v4  ;;  %v1356_v62 = vrot.slane %v1355_v60, 4  ;;  %v1370_v2 = vrot.slane %v1368_v25, 5 }
  0xb5   : > { %v2396_v48 = vsel %vm3733_vm7, %v2928_v20, %v2395_v35  ;;  %v2399_v28 = vsel %vm3733_vm7, %v2397_v27, %v2398_v56 }
  0xb6   : > { %3182 = vmatmul.mubr.msk.bf16.gmra.mrb[4].mxu0 %vm447_vm3, %v2933_v12  ;;  %v1361_v24 = vsel %vm3567_vm4, %v1356_v62, %v1360_v55  ;;  %v2937_v30 = vcombine.low %v2396_v48, %v2399_v28 }
  0xb7   : > { %3100 = vmatmul.mubr.msk.bf16.gmra.mrb[12].mxu1 %vm447_vm3, %v2810_v45  ;;  %3185 = vmatprep.mubr.msk.bf16.mxu0 %vm447_vm3, %v2934_v3  ;;  %v1366_v45 = vrot.slane %v1365_v40, 4 }
  0xb8   : > { %3113 = vmatprep.mubr.msk.bf16.mxu1 %vm447_vm3, %v2824_v18 }
  0xb9   : > { %v1371_v52 = vsel %vm3567_vm4, %v1366_v45, %v1370_v2 }
  0xba   : > { %v2827_v17 = vcombine.low %v1361_v24, %v1371_v52 }
  0xbe   : > { %3186 = vmatmul.mubr.msk.bf16.gmra.mrb[8].mxu0 %vm447_vm3, %v2935_v44 }
  0xbf   : > { %3114 = vmatmul.mubr.msk.bf16.vlgmr.msra.gmra.mrb[8].mxu1 %vm447_vm3, %v4344_v50  ;;  %3189 = vmatprep.mubr.msk.bf16.mxu0 %vm447_vm3, %v2936_v13 }
  0xc0   : > { %3117 = vmatprep.mubr.msk.bf16.mxu1 %vm447_vm3, %v2826_v23 }
  0xc6   : > { %3190 = vmatmul.mubr.msk.bf16.gmra.mrb[12].mxu0 %vm447_vm3, %v2937_v30 }
  0xc7   : > { %3118 = vmatmul.mubr.msk.bf16.gmra.mrb[12].mxu1 %vm447_vm3, %v2827_v17 }
 0x172   : > { %v3089_v50 = vpop.f32.mrb[0].mxu1 }
 0x173   : > { %v1101_v9 = vpop.f32.mrb[1].mxu1 }
 0x174   : > { %v3090_v59 = vpop.f32.mrb[2].mxu1 }
 0x175   : > { %v1104_v5 = vpop.f32.mrb[3].mxu1 }
 0x17a   : > { %v3093_v54 = vpop.f32.mrb[4].mxu1 }
 0x17b   : > { %v1117_v49 = vpop.f32.mrb[5].mxu1 }
 0x17c   : > { %v3094_v39 = vpop.f32.mrb[6].mxu1 }
 0x17d   : > { %v1120_v32 = vpop.f32.mrb[7].mxu1 }
 0x181   : > { %v3179_v42 = vpop.f32.mrb[0].mxu0 }
 0x182   : > { %v3195_v61 = vadd.f32 %v3179_v42, %v3089_v50  ;;  %v2487_v0 = vpop.f32.mrb[1].mxu0 }
 0x183   : > { %v3196_v10 = vadd.f32 %v2487_v0, %v1101_v9  ;;  %v3180_v11 = vpop.f32.mrb[2].mxu0 }
 0x184   : > { %v2575_v14 = vadd.f32 %v3195_v61, %v4446_v29  ;;  %v3197_v12 = vadd.f32 %v3180_v11, %v3090_v59  ;;  %v2490_v37 = vpop.f32.mrb[3].mxu0 }
 0x185   : > { %v2573_v38 = vadd.f32 %v3196_v10, %v4446_v29  ;;  %v3198_v31 = vadd.f32 %v2490_v37, %v1104_v5 }
 0x186   : > { %2591 = vst.msk [vmem:[%s4451_s6 + $0x10] sm:$0xff] %vm447_vm3, %v2575_v14  ;;  %v2576_v16 = vadd.f32 %v3197_v12, %v4446_v29 }
 0x187   : > { %2589 = vst.msk [vmem:[%s4451_s6] sm:$0xff] %vm447_vm3, %v2573_v38  ;;  %v2574_v3 = vadd.f32 %v3198_v31, %v4446_v29 }
 0x188   : > { %2592 = vst.msk [vmem:[%s4451_s6 + $0x18] sm:$0xff] %vm447_vm3, %v2576_v16 }
 0x189   : > { %2590 = vst.msk [vmem:[%s4451_s6 + $0x8] sm:$0xff] %vm447_vm3, %v2574_v3  ;;  %v3183_v34 = vpop.f32.mrb[4].mxu0 }
 0x18a   : > { %v3199_v46 = vadd.f32 %v3183_v34, %v3093_v54  ;;  %v2503_v7 = vpop.f32.mrb[5].mxu0 }
 0x18b   : > { %v3200_v6 = vadd.f32 %v2503_v7, %v1117_v49  ;;  %v3184_v18 = vpop.f32.mrb[6].mxu0 }
 0x18c   : > { %v2579_v1 = vadd.f32 %v3199_v46, %v4446_v29  ;;  %v3201_v26 = vadd.f32 %v3184_v18, %v3094_v39  ;;  %v2506_v33 = vpop.f32.mrb[7].mxu0 }
 0x18d   : > { %v2577_v21 = vadd.f32 %v3200_v6, %v4446_v29  ;;  %v3202_v57 = vadd.f32 %v2506_v33, %v1120_v32 }
 0x18e   : > { %2595 = vst.msk [vmem:[%s4451_s6 + $0x30] sm:$0xff] %vm447_vm3, %v2579_v1  ;;  %v2580_v8 = vadd.f32 %v3201_v26, %v4446_v29 }
 0x18f   : > { %2593 = vst.msk [vmem:[%s4451_s6 + $0x20] sm:$0xff] %vm447_vm3, %v2577_v21  ;;  %v2578_v55 = vadd.f32 %v3202_v57, %v4446_v29 }
 0x190   : > { %2596 = vst.msk [vmem:[%s4451_s6 + $0x38] sm:$0xff] %vm447_vm3, %v2580_v8 }
 0x191   : > { %2594 = vst.msk [vmem:[%s4451_s6 + $0x28] sm:$0xff] %vm447_vm3, %v2578_v55  ;;  %v3187_v63 = vpop.f32.mrb[8].mxu0 }
 0x192   : > { %v3115_v19 = vpop.f32.mrb[8].mxu1  ;;  %v2519_v53 = vpop.f32.mrb[9].mxu0 }
 0x193   : > { %v3203_v58 = vadd.f32 %v3187_v63, %v3115_v19  ;;  %v1491_v36 = vpop.f32.mrb[9].mxu1  ;;  %v3188_v43 = vpop.f32.mrb[10].mxu0 }
 0x194   : > { %v3204_v22 = vadd.f32 %v2519_v53, %v1491_v36  ;;  %v3116_v35 = vpop.f32.mrb[10].mxu1  ;;  %v2522_v47 = vpop.f32.mrb[11].mxu0 }
 0x195   : > { %v2583_v60 = vadd.f32 %v3203_v58, %v4446_v29  ;;  %v3205_v40 = vadd.f32 %v3188_v43, %v3116_v35  ;;  %v1494_v15 = vpop.f32.mrb[11].mxu1 }
 0x196   : > { %v2581_v25 = vadd.f32 %v3204_v22, %v4446_v29  ;;  %v3206_v51 = vadd.f32 %v2522_v47, %v1494_v15 }
 0x197   : > { %2599 = vst.msk [vmem:[%s4451_s6 + $0x50] sm:$0xff] %vm447_vm3, %v2583_v60  ;;  %v2584_v4 = vadd.f32 %v3205_v40, %v4446_v29 }
 0x198   : > { %2597 = vst.msk [vmem:[%s4451_s6 + $0x40] sm:$0xff] %vm447_vm3, %v2581_v25  ;;  %v2582_v44 = vadd.f32 %v3206_v51, %v4446_v29 }
 0x199   : > { %2600 = vst.msk [vmem:[%s4451_s6 + $0x58] sm:$0xff] %vm447_vm3, %v2584_v4  ;;  %v3191_v13 = vpop.f32.mrb[12].mxu0 }
 0x19a   : > { %2598 = vst.msk [vmem:[%s4451_s6 + $0x48] sm:$0xff] %vm447_vm3, %v2582_v44  ;;  %v3119_v41 = vpop.f32.mrb[12].mxu1  ;;  %v2535_v20 = vpop.f32.mrb[13].mxu0 }
 0x19b   : > { %v3207_v27 = vadd.f32 %v3191_v13, %v3119_v41  ;;  %v1507_v56 = vpop.f32.mrb[13].mxu1  ;;  %v3192_v23 = vpop.f32.mrb[14].mxu0 }
 0x19c   : > { %v3208_v62 = vadd.f32 %v2535_v20, %v1507_v56  ;;  %v3120_v45 = vpop.f32.mrb[14].mxu1  ;;  %v2538_v2 = vpop.f32.mrb[15].mxu0 }
 0x19d   : > { %v2587_v48 = vadd.f32 %v3207_v27, %v4446_v29  ;;  %v3209_v28 = vadd.f32 %v3192_v23, %v3120_v45  ;;  %v1510_v24 = vpop.f32.mrb[15].mxu1 }
 0x19e   : > { %v2585_v52 = vadd.f32 %v3208_v62, %v4446_v29  ;;  %v3210_v30 = vadd.f32 %v2538_v2, %v1510_v24 }
 0x19f   : > { %2603 = vst.msk [vmem:[%s4451_s6 + $0x70] sm:$0xff] %vm447_vm3, %v2587_v48  ;;  %v2588_v17 = vadd.f32 %v3209_v28, %v4446_v29 }
 0x1a0   : > { %2601 = vst.msk [vmem:[%s4451_s6 + $0x60] sm:$0xff] %vm447_vm3, %v2585_v52  ;;  %v2586_v50 = vadd.f32 %v3210_v30, %v4446_v29 }
 0x1a1   : > { %2604 = vst.msk [vmem:[%s4451_s6 + $0x78] sm:$0xff] %vm447_vm3, %v2588_v17 }
 0x1a2   : > { %2602 = vst.msk [vmem:[%s4451_s6 + $0x68] sm:$0xff] %vm447_vm3, %v2586_v50 }
 0x1a3 PF: > { %s13_s16 = sadd.s32 1, %s3444_s16   ;;  %s4599_s12 = smov %s3436_s14 }
 0x1a4   : > { %p10_p7 = scmp.ge.s32.totalorder %s13_s16, 6   ;;  %s4600_s13 = smov %s3440_s15 }
 0x1a5   : > { %s4601_s14 = smov %s4604_s17  ;;  %s4602_s15 = smov %s4608_s18 }
 0x1a6   :  { %12 = sbr.rel (!%p10_p7) target bundleno = 3 (0x3), region = 73 }

</bundles_post_ra>
